<compile_context>
chip_gen: v7x
topology: tpu7x:2x2x1
jax: 0.10.0
libtpu: 0.0.40
codegen_flags: <defaults>
</compile_context>

<pallas_src>
import functools
import math

import jax
import jax.numpy as jnp
from jax.experimental import pallas as pl
from jax.experimental.pallas import tpu as pltpu

LANE = 128
SUBLANE = 8


def _round_up(v, m):
    return -(-v // m) * m


# ----------------------------------------------------------------------------
# Pallas kernel: one GCNConv layer  out = (A_hat @ X) @ W + b  (optional ReLU)
# Grid: (row_tiles, k_tiles); A_hat is streamed, X/W/b are VMEM-resident.
# ----------------------------------------------------------------------------
def _gcn_layer_kernel(a_ref, x_ref, w_ref, b_ref, o_ref, acc_ref, *, apply_relu, tk):
    k = pl.program_id(1)

    @pl.when(k == 0)
    def _init():
        acc_ref[...] = jnp.zeros_like(acc_ref)

    # acc += A[i-tile, k-tile] @ X[k-tile, :]  (bf16 MXU, f32 accumulate).
    # X is fully resident; slice the current k rows out of the VMEM block.
    xk = x_ref[pl.ds(pl.multiple_of(k * tk, tk), tk), :]
    acc_ref[...] += jnp.dot(a_ref[...], xk, preferred_element_type=jnp.float32)

    @pl.when(k == pl.num_programs(1) - 1)
    def _epilogue():
        # (A @ X) @ W: bf16 MXU matmul with f32 accumulation; bias/ReLU in f32.
        out = jnp.dot(acc_ref[...].astype(jnp.bfloat16), w_ref[...],
                      preferred_element_type=jnp.float32)
        out = out + b_ref[...]
        if apply_relu:
            out = jnp.maximum(out, 0.0)
        o_ref[...] = out.astype(o_ref.dtype)


def gcn_conv_pallas(a_hat_p, x_p, w_p, b_p, *, apply_relu, out_dtype, tm, tk):
    """One GCNConv layer on padded operands.

    a_hat_p: [Np, Np]       bf16 (streamed in (tm, tk) tiles)
    x_p:     [Np, Fin_p]    bf16 (VMEM-resident)
    w_p:     [Fin_p, Fout_p] bf16 (VMEM-resident)
    b_p:     [1, Fout_p]    f32
    """
    npad = a_hat_p.shape[0]
    fin_p = x_p.shape[1]
    fout_p = w_p.shape[1]
    assert tm % SUBLANE == 0 and tk % LANE == 0
    assert npad % tm == 0 and npad % tk == 0
    assert fin_p % LANE == 0 and fout_p % LANE == 0

    kernel = functools.partial(_gcn_layer_kernel, apply_relu=apply_relu, tk=tk)
    return pl.pallas_call(
        kernel,
        out_shape=jax.ShapeDtypeStruct((npad, fout_p), out_dtype),
        grid=(npad // tm, npad // tk),
        in_specs=[
            pl.BlockSpec((tm, tk), lambda i, k: (i, k)),          # A_hat tile (streamed)
            pl.BlockSpec((npad, fin_p), lambda i, k: (0, 0)),     # X resident (no re-reads)
            pl.BlockSpec((fin_p, fout_p), lambda i, k: (0, 0)),   # W resident (bf16)
            pl.BlockSpec((1, fout_p), lambda i, k: (0, 0)),       # bias row (f32)
        ],
        out_specs=pl.BlockSpec((tm, fout_p), lambda i, k: (i, 0)),
        scratch_shapes=[pltpu.VMEM((tm, fin_p), jnp.float32)],
        compiler_params=pltpu.CompilerParams(
            dimension_semantics=("parallel", "arbitrary"),
            # Explicit: v5e default scoped limit is only 16 MiB; still well
            # under v7x's 64 MiB physical VMEM.
            vmem_limit_bytes=32 * 1024 * 1024,
        ),
    )(a_hat_p, x_p, w_p, b_p)


# ----------------------------------------------------------------------------
# Dense symmetric-normalized adjacency (PyG gcn_norm semantics), built directly
# in transposed orientation, padded, scaled and cast in one fused pass:
#   M[d, s] = deg(d)^-1/2 * A[s, d] * deg(s)^-1/2   so that  out = M @ x
#   self loops added only where missing (add_remaining_self_loops).
# ----------------------------------------------------------------------------
def normalized_adjacency_padded(edge_index, num_nodes, npad, dtype=jnp.bfloat16):
    # TODO(synk): for large graphs replace this dense O(N^2) build with a sparse
    # scalar-prefetch gather/accumulate kernel over edge_index.
    src, dst = edge_index[0], edge_index[1]
    at = jnp.zeros((npad, npad), jnp.float32).at[dst, src].add(1.0)  # At[d, s]
    idx = jnp.arange(num_nodes)
    diag = at[idx, idx]
    at = at.at[idx, idx].set(jnp.where(diag > 0.0, diag, 1.0))       # remaining self loops
    deg = jnp.sum(at, axis=1)                                        # in-degree incl. self loops
    dinv = jnp.where(deg > 0, jax.lax.rsqrt(deg), 0.0)
    return (dinv[:, None] * at * dinv[None, :]).astype(dtype)


# ----------------------------------------------------------------------------
# Full GCN forward
# ----------------------------------------------------------------------------
def gcn_forward(x, edge_index, params, dropout=0.4, training=False, *, tm=512, tk=512):
    n, fin = x.shape
    hid = params["w1"].shape[1]
    out_c = params["w2"].shape[1]

    fin_p = _round_up(fin, LANE)
    hid_p = _round_up(hid, LANE)
    out_p = _round_up(out_c, LANE)

    # Clamp tiles to the (128-padded) graph size; keep lcm(tm, tk) small so the
    # O(npad^2) A_hat padding never exceeds one tile.
    npad0 = _round_up(n, LANE)
    tm = min(tm, npad0)
    tk = min(tk, npad0)
    node_mult = (tm * tk) // math.gcd(tm, tk)
    npad = _round_up(n, node_mult)
    # v7x megacore: keep >= 2 row tiles on the "parallel" axis so both
    # TensorCores get work (no-op once npad >= 2*tm).
    if npad // tm < 2 and (npad // 2) % SUBLANE == 0:
        tm = npad // 2

    a_p = normalized_adjacency_padded(edge_index, n, npad, jnp.bfloat16)
    x_p = jnp.zeros((npad, fin_p), jnp.bfloat16).at[:n, :fin].set(
        x.astype(jnp.bfloat16))

    w1_p = jnp.zeros((fin_p, hid_p), jnp.bfloat16).at[:fin, :hid].set(
        params["w1"].astype(jnp.bfloat16))
    b1_p = jnp.zeros((1, hid_p), jnp.float32).at[0, :hid].set(params["b1"])
    w2_p = jnp.zeros((hid_p, out_p), jnp.bfloat16).at[:hid, :out_c].set(
        params["w2"].astype(jnp.bfloat16))
    b2_p = jnp.zeros((1, out_p), jnp.float32).at[0, :out_c].set(params["b2"])

    # Layer 1: (A @ X) @ W1 + b1, ReLU, bf16 output written directly in-kernel.
    h_p = gcn_conv_pallas(a_p, x_p, w1_p, b1_p, apply_relu=True,
                          out_dtype=jnp.bfloat16, tm=tm, tk=tk)
    # TODO(synk): F.dropout with training=True (stochastic mask) not implemented;
    # eval mode (training=False) makes it an identity, which is reproduced here.
    out_pad = gcn_conv_pallas(a_p, h_p, w2_p, b2_p, apply_relu=False,
                              out_dtype=jnp.float32, tm=tm, tk=tk)
    return out_pad[:n, :out_c]


def init_params(key, in_c, hid_c, out_c):
    k1, k2 = jax.random.split(key)

    def glorot(k, fan_in, fan_out):
        lim = jnp.sqrt(6.0 / (fan_in + fan_out))
        return jax.random.uniform(k, (fan_in, fan_out), jnp.float32, -lim, lim)

    return {
        "w1": glorot(k1, in_c, hid_c),
        "b1": jnp.zeros((hid_c,), jnp.float32),
        "w2": glorot(k2, hid_c, out_c),
        "b2": jnp.zeros((out_c,), jnp.float32),
    }


if __name__ == "__main__":
    N, IN_C, HID_C, OUT_C, E = 300, 8, 32, 4, 900

    key = jax.random.PRNGKey(0)
    kx, ke, kp = jax.random.split(key, 3)

    x = jax.random.normal(kx, (N, IN_C), jnp.float32)
    edge_index = jax.random.randint(ke, (2, E), 0, N, dtype=jnp.int32)
    params = init_params(kp, IN_C, HID_C, OUT_C)

    # Default (large) tiles, and small tiles that force a 3x3 grid exercising
    # the multi-k-step accumulator and the resident-X reuse across row tiles.
    fwd_default = jax.jit(gcn_forward)
    fwd_small = jax.jit(functools.partial(gcn_forward, tm=128, tk=128))
    out_default = jax.block_until_ready(fwd_default(x, edge_index, params))
    out_small = jax.block_until_ready(fwd_small(x, edge_index, params))

    # Pure-JAX reference of the same math, mirroring the kernel's bf16 casts
    # (A, X, W, the A@X accumulator, and the bf16 layer-1 output).
    hi = jax.lax.Precision.HIGHEST
    a_hat = normalized_adjacency_padded(edge_index, N, N, jnp.float32)
    aq = a_hat.astype(jnp.bfloat16).astype(jnp.float32)
    xq = x.astype(jnp.bfloat16).astype(jnp.float32)
    w1q = params["w1"].astype(jnp.bfloat16).astype(jnp.float32)
    w2q = params["w2"].astype(jnp.bfloat16).astype(jnp.float32)

    ax1 = jnp.matmul(aq, xq, precision=hi).astype(jnp.bfloat16).astype(jnp.float32)
    h = jnp.maximum(jnp.matmul(ax1, w1q, precision=hi) + params["b1"], 0.0)
    hq = h.astype(jnp.bfloat16).astype(jnp.float32)
    ax2 = jnp.matmul(aq, hq, precision=hi).astype(jnp.bfloat16).astype(jnp.float32)
    ref = jnp.matmul(ax2, w2q, precision=hi) + params["b2"]

    # Full-f32 reference (no quantization) for a loose sanity check.
    h32 = jnp.maximum(
        jnp.matmul(jnp.matmul(a_hat, x, precision=hi), params["w1"], precision=hi)
        + params["b1"], 0.0)
    ref32 = (jnp.matmul(jnp.matmul(a_hat, h32, precision=hi), params["w2"], precision=hi)
             + params["b2"])

    assert out_default.shape == (N, OUT_C)
    assert out_small.shape == (N, OUT_C)
    assert jnp.allclose(out_default, ref, atol=5e-3, rtol=5e-3)
    assert jnp.allclose(out_small, ref, atol=5e-3, rtol=5e-3)
    assert jnp.allclose(out_default, out_small, atol=5e-3, rtol=5e-3)
    assert jnp.allclose(out_default, ref32, atol=5e-2, rtol=5e-2)

    print("KERNEL_OK")
</pallas_src>

<mosaic_0001>
module attributes {stable_mosaic.version = 11 : i64} {
  func.func @_gcn_layer_kernel(%arg0: i32, %arg1: i32, %arg2: memref<192x384xbf16, #tpu.memory_space<vmem>>, %arg3: memref<384x128xbf16, #tpu.memory_space<vmem>>, %arg4: memref<128x128xbf16, #tpu.memory_space<vmem>>, %arg5: memref<1x128xf32, #tpu.memory_space<vmem>>, %arg6: memref<192x128xbf16, #tpu.memory_space<vmem>>, %arg7: memref<192x128xf32, #tpu.memory_space<vmem>>) attributes {dimension_semantics = [#tpu.dimension_semantics<parallel>, #tpu.dimension_semantics<arbitrary>], iteration_bounds = array<i64: 2, 1>, scalar_prefetch = 0 : i64, scratch_operands = 1 : i64, tpu.core_type = #tpu.core_type<tc>, window_params = [{transform_indices = @transform_0, window_bounds = array<i64: 192, 384>}, {pipeline_mode = #tpu.pipeline_mode<synchronous>, transform_indices = @transform_1, window_bounds = array<i64: 384, 128>}, {pipeline_mode = #tpu.pipeline_mode<synchronous>, transform_indices = @transform_2, window_bounds = array<i64: 128, 128>}, {pipeline_mode = #tpu.pipeline_mode<synchronous>, transform_indices = @transform_3, window_bounds = array<i64: 1, 128>}, {transform_indices = @transform_4, window_bounds = array<i64: 192, 128>}]} {
    %c0_i32 = arith.constant 0 : i32
    %0 = arith.cmpi eq, %arg1, %c0_i32 : i32
    %1 = arith.extui %0 : i1 to i32
    %c0_i32_0 = arith.constant 0 : i32
    %2 = arith.cmpi ne, %1, %c0_i32_0 : i32
    scf.if %2 {
      %cst_9 = arith.constant 0.000000e+00 : f32
      %15 = vector.broadcast %cst_9 : f32 to vector<192x128xf32>
      %c0_10 = arith.constant 0 : index
      %c0_11 = arith.constant 0 : index
      %16 = vector.load %arg7[%c0_10, %c0_11] : memref<192x128xf32, #tpu.memory_space<vmem>>, vector<192x128xf32>
      tpu.vector_store %arg7[%c0_10, %c0_11], %15 {strides = array<i32>} : memref<192x128xf32, #tpu.memory_space<vmem>>, vector<192x128xf32>,
    } else {
    }
    %c384_i32 = arith.constant 384 : i32
    %3 = arith.muli %arg1, %c384_i32 : i32
    %4 = tpu.assume_multiple %3, 384 : i32
    %5 = arith.index_cast %4 : i32 to index
    %c0 = arith.constant 0 : index
    %6 = vector.load %arg3[%5, %c0] : memref<384x128xbf16, #tpu.memory_space<vmem>>, vector<384x128xbf16>
    %c0_1 = arith.constant 0 : index
    %c0_2 = arith.constant 0 : index
    %7 = vector.load %arg7[%c0_1, %c0_2] : memref<192x128xf32, #tpu.memory_space<vmem>>, vector<192x128xf32>
    %c0_3 = arith.constant 0 : index
    %c0_4 = arith.constant 0 : index
    %8 = vector.load %arg2[%c0_3, %c0_4] : memref<192x384xbf16, #tpu.memory_space<vmem>>, vector<192x384xbf16>
    %cst = arith.constant dense<0.000000e+00> : vector<192x128xf32>
    %9 = tpu.matmul %8, %6, %cst {dimension_numbers = #tpu.dot_dimension_numbers<[1], [0], [0], [1], [0, 0, 1, 1], [], []>} : vector<192x384xbf16>, vector<384x128xbf16>, vector<192x128xf32> -> vector<192x128xf32>
    %10 = arith.addf %7, %9 : vector<192x128xf32>
    %c0_5 = arith.constant 0 : index
    %c0_6 = arith.constant 0 : index
    %11 = vector.load %arg7[%c0_5, %c0_6] : memref<192x128xf32, #tpu.memory_space<vmem>>, vector<192x128xf32>
    tpu.vector_store %arg7[%c0_5, %c0_6], %10 {strides = array<i32>} : memref<192x128xf32, #tpu.memory_space<vmem>>, vector<192x128xf32>,
    %c0_i32_7 = arith.constant 0 : i32
    %12 = arith.cmpi eq, %arg1, %c0_i32_7 : i32
    %13 = arith.extui %12 : i1 to i32
    %c0_i32_8 = arith.constant 0 : i32
    %14 = arith.cmpi ne, %13, %c0_i32_8 : i32
    scf.if %14 {
      %c0_9 = arith.constant 0 : index
      %c0_10 = arith.constant 0 : index
      %15 = vector.load %arg7[%c0_9, %c0_10] : memref<192x128xf32, #tpu.memory_space<vmem>>, vector<192x128xf32>
      %16 = arith.truncf %15 : vector<192x128xf32> to vector<192x128xbf16>
      %c0_11 = arith.constant 0 : index
      %c0_12 = arith.constant 0 : index
      %17 = vector.load %arg4[%c0_11, %c0_12] : memref<128x128xbf16, #tpu.memory_space<vmem>>, vector<128x128xbf16>
      %cst_13 = arith.constant dense<0.000000e+00> : vector<192x128xf32>
      %18 = tpu.matmul %16, %17, %cst_13 {dimension_numbers = #tpu.dot_dimension_numbers<[1], [0], [0], [1], [0, 0, 1, 1], [], []>} : vector<192x128xbf16>, vector<128x128xbf16>, vector<192x128xf32> -> vector<192x128xf32>
      %c0_14 = arith.constant 0 : index
      %c0_15 = arith.constant 0 : index
      %19 = vector.load %arg5[%c0_14, %c0_15] : memref<1x128xf32, #tpu.memory_space<vmem>>, vector<1x128xf32>
      %20 = vector.broadcast %19 : vector<1x128xf32> to vector<192x128xf32>
      %21 = arith.addf %18, %20 : vector<192x128xf32>
      %cst_16 = arith.constant 0.000000e+00 : f32
      %22 = vector.broadcast %cst_16 : f32 to vector<192x128xf32>
      %23 = arith.maximumf %21, %22 : vector<192x128xf32>
      %24 = arith.truncf %23 : vector<192x128xf32> to vector<192x128xbf16>
      %c0_17 = arith.constant 0 : index
      %c0_18 = arith.constant 0 : index
      %25 = vector.load %arg6[%c0_17, %c0_18] : memref<192x128xbf16, #tpu.memory_space<vmem>>, vector<192x128xbf16>
      tpu.vector_store %arg6[%c0_17, %c0_18], %24 {strides = array<i32>} : memref<192x128xbf16, #tpu.memory_space<vmem>>, vector<192x128xbf16>,
    } else {
    }
    return
  }
  func.func @transform_0(%arg0: i32, %arg1: i32) -> (i32, i32) {
    %c0_i32 = arith.constant 0 : i32
    return %arg0, %arg1 : i32, i32
  }
  func.func @transform_1(%arg0: i32, %arg1: i32) -> (i32, i32) {
    %c0_i32 = arith.constant 0 : i32
    %c0_i32_0 = arith.constant 0 : i32
    %c0_i32_1 = arith.constant 0 : i32
    return %c0_i32, %c0_i32_0 : i32, i32
  }
  func.func @transform_2(%arg0: i32, %arg1: i32) -> (i32, i32) {
    %c0_i32 = arith.constant 0 : i32
    %c0_i32_0 = arith.constant 0 : i32
    %c0_i32_1 = arith.constant 0 : i32
    return %c0_i32, %c0_i32_0 : i32, i32
  }
  func.func @transform_3(%arg0: i32, %arg1: i32) -> (i32, i32) {
    %c0_i32 = arith.constant 0 : i32
    %c0_i32_0 = arith.constant 0 : i32
    %c0_i32_1 = arith.constant 0 : i32
    return %c0_i32, %c0_i32_0 : i32, i32
  }
  func.func @transform_4(%arg0: i32, %arg1: i32) -> (i32, i32) {
    %c0_i32 = arith.constant 0 : i32
    %c0_i32_0 = arith.constant 0 : i32
    return %arg0, %c0_i32 : i32, i32
  }
}

module attributes {stable_mosaic.version = 11 : i64} {
  func.func @_gcn_layer_kernel(%arg0: i32, %arg1: i32, %arg2: memref<192x384xbf16, #tpu.memory_space<vmem>>, %arg3: memref<384x128xbf16, #tpu.memory_space<vmem>>, %arg4: memref<128x128xbf16, #tpu.memory_space<vmem>>, %arg5: memref<1x128xf32, #tpu.memory_space<vmem>>, %arg6: memref<192x128xf32, #tpu.memory_space<vmem>>, %arg7: memref<192x128xf32, #tpu.memory_space<vmem>>) attributes {dimension_semantics = [#tpu.dimension_semantics<parallel>, #tpu.dimension_semantics<arbitrary>], iteration_bounds = array<i64: 2, 1>, scalar_prefetch = 0 : i64, scratch_operands = 1 : i64, tpu.core_type = #tpu.core_type<tc>, window_params = [{transform_indices = @transform_0, window_bounds = array<i64: 192, 384>}, {pipeline_mode = #tpu.pipeline_mode<synchronous>, transform_indices = @transform_1, window_bounds = array<i64: 384, 128>}, {pipeline_mode = #tpu.pipeline_mode<synchronous>, transform_indices = @transform_2, window_bounds = array<i64: 128, 128>}, {pipeline_mode = #tpu.pipeline_mode<synchronous>, transform_indices = @transform_3, window_bounds = array<i64: 1, 128>}, {transform_indices = @transform_4, window_bounds = array<i64: 192, 128>}]} {
    %c0_i32 = arith.constant 0 : i32
    %0 = arith.cmpi eq, %arg1, %c0_i32 : i32
    %1 = arith.extui %0 : i1 to i32
    %c0_i32_0 = arith.constant 0 : i32
    %2 = arith.cmpi ne, %1, %c0_i32_0 : i32
    scf.if %2 {
      %cst_9 = arith.constant 0.000000e+00 : f32
      %15 = vector.broadcast %cst_9 : f32 to vector<192x128xf32>
      %c0_10 = arith.constant 0 : index
      %c0_11 = arith.constant 0 : index
      %16 = vector.load %arg7[%c0_10, %c0_11] : memref<192x128xf32, #tpu.memory_space<vmem>>, vector<192x128xf32>
      tpu.vector_store %arg7[%c0_10, %c0_11], %15 {strides = array<i32>} : memref<192x128xf32, #tpu.memory_space<vmem>>, vector<192x128xf32>,
    } else {
    }
    %c384_i32 = arith.constant 384 : i32
    %3 = arith.muli %arg1, %c384_i32 : i32
    %4 = tpu.assume_multiple %3, 384 : i32
    %5 = arith.index_cast %4 : i32 to index
    %c0 = arith.constant 0 : index
    %6 = vector.load %arg3[%5, %c0] : memref<384x128xbf16, #tpu.memory_space<vmem>>, vector<384x128xbf16>
    %c0_1 = arith.constant 0 : index
    %c0_2 = arith.constant 0 : index
    %7 = vector.load %arg7[%c0_1, %c0_2] : memref<192x128xf32, #tpu.memory_space<vmem>>, vector<192x128xf32>
    %c0_3 = arith.constant 0 : index
    %c0_4 = arith.constant 0 : index
    %8 = vector.load %arg2[%c0_3, %c0_4] : memref<192x384xbf16, #tpu.memory_space<vmem>>, vector<192x384xbf16>
    %cst = arith.constant dense<0.000000e+00> : vector<192x128xf32>
    %9 = tpu.matmul %8, %6, %cst {dimension_numbers = #tpu.dot_dimension_numbers<[1], [0], [0], [1], [0, 0, 1, 1], [], []>} : vector<192x384xbf16>, vector<384x128xbf16>, vector<192x128xf32> -> vector<192x128xf32>
    %10 = arith.addf %7, %9 : vector<192x128xf32>
    %c0_5 = arith.constant 0 : index
    %c0_6 = arith.constant 0 : index
    %11 = vector.load %arg7[%c0_5, %c0_6] : memref<192x128xf32, #tpu.memory_space<vmem>>, vector<192x128xf32>
    tpu.vector_store %arg7[%c0_5, %c0_6], %10 {strides = array<i32>} : memref<192x128xf32, #tpu.memory_space<vmem>>, vector<192x128xf32>,
    %c0_i32_7 = arith.constant 0 : i32
    %12 = arith.cmpi eq, %arg1, %c0_i32_7 : i32
    %13 = arith.extui %12 : i1 to i32
    %c0_i32_8 = arith.constant 0 : i32
    %14 = arith.cmpi ne, %13, %c0_i32_8 : i32
    scf.if %14 {
      %c0_9 = arith.constant 0 : index
      %c0_10 = arith.constant 0 : index
      %15 = vector.load %arg7[%c0_9, %c0_10] : memref<192x128xf32, #tpu.memory_space<vmem>>, vector<192x128xf32>
      %16 = arith.truncf %15 : vector<192x128xf32> to vector<192x128xbf16>
      %c0_11 = arith.constant 0 : index
      %c0_12 = arith.constant 0 : index
      %17 = vector.load %arg4[%c0_11, %c0_12] : memref<128x128xbf16, #tpu.memory_space<vmem>>, vector<128x128xbf16>
      %cst_13 = arith.constant dense<0.000000e+00> : vector<192x128xf32>
      %18 = tpu.matmul %16, %17, %cst_13 {dimension_numbers = #tpu.dot_dimension_numbers<[1], [0], [0], [1], [0, 0, 1, 1], [], []>} : vector<192x128xbf16>, vector<128x128xbf16>, vector<192x128xf32> -> vector<192x128xf32>
      %c0_14 = arith.constant 0 : index
      %c0_15 = arith.constant 0 : index
      %19 = vector.load %arg5[%c0_14, %c0_15] : memref<1x128xf32, #tpu.memory_space<vmem>>, vector<1x128xf32>
      %20 = vector.broadcast %19 : vector<1x128xf32> to vector<192x128xf32>
      %21 = arith.addf %18, %20 : vector<192x128xf32>
      %c0_16 = arith.constant 0 : index
      %c0_17 = arith.constant 0 : index
      %22 = vector.load %arg6[%c0_16, %c0_17] : memref<192x128xf32, #tpu.memory_space<vmem>>, vector<192x128xf32>
      tpu.vector_store %arg6[%c0_16, %c0_17], %21 {strides = array<i32>} : memref<192x128xf32, #tpu.memory_space<vmem>>, vector<192x128xf32>,
    } else {
    }
    return
  }
  func.func @transform_0(%arg0: i32, %arg1: i32) -> (i32, i32) {
    %c0_i32 = arith.constant 0 : i32
    return %arg0, %arg1 : i32, i32
  }
  func.func @transform_1(%arg0: i32, %arg1: i32) -> (i32, i32) {
    %c0_i32 = arith.constant 0 : i32
    %c0_i32_0 = arith.constant 0 : i32
    %c0_i32_1 = arith.constant 0 : i32
    return %c0_i32, %c0_i32_0 : i32, i32
  }
  func.func @transform_2(%arg0: i32, %arg1: i32) -> (i32, i32) {
    %c0_i32 = arith.constant 0 : i32
    %c0_i32_0 = arith.constant 0 : i32
    %c0_i32_1 = arith.constant 0 : i32
    return %c0_i32, %c0_i32_0 : i32, i32
  }
  func.func @transform_3(%arg0: i32, %arg1: i32) -> (i32, i32) {
    %c0_i32 = arith.constant 0 : i32
    %c0_i32_0 = arith.constant 0 : i32
    %c0_i32_1 = arith.constant 0 : i32
    return %c0_i32, %c0_i32_0 : i32, i32
  }
  func.func @transform_4(%arg0: i32, %arg1: i32) -> (i32, i32) {
    %c0_i32 = arith.constant 0 : i32
    %c0_i32_0 = arith.constant 0 : i32
    return %arg0, %c0_i32 : i32, i32
  }
}

</mosaic_0001>

<bundles_post_ra>
// kernel: gcn_forward.3
= control target key start
LH: loop header
LB: loop body
LE: loop exit
PB: predicated region body
PF: predicated region fallthrough
CT: control target
= control target key end

     0   :  { %s1804_s15 = smov 0   ;;  %s1806_s16 = smov 0   ;;  %s2036_s0 = inlined_call_operand.vmem [shape: bf16[384,384], index: 0, kind: input, shape index: {}]   ;;  %s2037_s1 = inlined_call_operand.vmem [shape: bf16[384,128], index: 1, kind: input, shape index: {}]   ;;  %s2038_s2 = inlined_call_operand.vmem [shape: bf16[128,128], index: 2, kind: input, shape index: {}]   ;;  %s2039_s3 = inlined_call_operand.vmem [shape: f32[1,128], index: 3, kind: input, shape index: {}]   ;;  %s2040_s4 = inlined_call_operand.vmem [shape: f32[384,128], index: 4, kind: output, shape index: {}]  }
   0x1   :  { %s1808_s17 = smov 0  }
   0x2 LB: > { %s26_s18 = sadd.s32 1, %s1773_s16  ;;  %p1368_p0 = scmp.ge.s32.totalorder %s1777_s17, 1  ;;  %s1777_s17 = sphi %s1808_s17, %s14_s17   ;;  %s1773_s16 = sphi %s1806_s16, %s2042_s16   ;;  %s1769_s15 = sphi %s1804_s15, %s2041_s15  }
   0x3   : > { %p28_p1 = scmp.ge.s32.totalorder %s26_s18, 2  ;;  %p183_p2 = scmp.lt.s32.totalorder %s1777_s17, 3 }
   0x5   : > { %s2044_s18 = smov (%p28_p1, %s26_s18), 0  ;;  %p184_p3 = pnand %p1368_p0, %p183_p2 }
   0x6   : > { %v1675_v0 = vld [vmem:[%s2037_s1 + $0x40] sm:$0xff] (!%p184_p3)   ;;  %v1678_v3 = vld [vmem:[%s2037_s1 + $0x48] sm:$0xff] (!%p184_p3)   ;;  %v1681_v6 = vld [vmem:[%s2037_s1 + $0x50] sm:$0xff] (!%p184_p3)   ;;  %s214_s7 = smul.u32 (!%p184_p3), 24, %s1769_s15 }
   0x7   : > { %187 = sbr.rel (%p184_p3) target bundleno = 566 (0x236), region = 36  ;;  %v1676_v1 = vld [vmem:[%s2037_s1] sm:$0xff] (!%p184_p3)   ;;  %1442 = vmatprep.subr.bf16.mxu0 (!%p184_p3), %v1675_v0  ;;  %v1679_v4 = vld [vmem:[%s2037_s1 + $0x8] sm:$0xff] (!%p184_p3)   ;;  %v1682_v7 = vld [vmem:[%s2037_s1 + $0x10] sm:$0xff] (!%p184_p3)  }
   0x8   : > { %v1677_v2 = vld [vmem:[%s2037_s1 + $0x80] sm:$0xff] (!%p184_p3)   ;;  %1443 = vmatpush3.bf16.msra.mxu0 (!%p184_p3), %v1676_v1  ;;  %v1680_v5 = vld [vmem:[%s2037_s1 + $0x88] sm:$0xff] (!%p184_p3)   ;;  %v1683_v8 = vld [vmem:[%s2037_s1 + $0x90] sm:$0xff] (!%p184_p3)   ;;  %p216_p4 = scmp.lt.s32.totalorder (!%p184_p3), %s214_s7, 47 }
   0x9   : > { %1570 = vmatprep.subr.bf16.mxu1 (!%p184_p3), %v1677_v2  ;;  %1444 = vmatprep.subr.bf16.mxu0 (!%p184_p3), %v1678_v3  ;;  %v1684_v9 = vld [vmem:[%s2037_s1 + $0x58] sm:$0xff] (!%p184_p3)   ;;  %v1687_v12 = vld [vmem:[%s2037_s1 + $0x60] sm:$0xff] (!%p184_p3)   ;;  %v1690_v15 = vld [vmem:[%s2037_s1 + $0x68] sm:$0xff] (!%p184_p3)  }
   0xa   : > { %1571 = vmatpush3.bf16.msra.mxu1 (!%p184_p3), %v1677_v2  ;;  %v1685_v10 = vld [vmem:[%s2037_s1 + $0x18] sm:$0xff] (!%p184_p3)   ;;  %v1689_v13 = vld [vmem:[%s2037_s1 + $0xa0] sm:$0xff] (!%p184_p3)   ;;  %v1692_v16 = vld [vmem:[%s2037_s1 + $0xa8] sm:$0xff] (!%p184_p3)  }
   0xb   : > { %1572 = vmatprep.subr.bf16.mxu1 (!%p184_p3), %v1680_v5  ;;  %v1686_v11 = vld [vmem:[%s2037_s1 + $0x98] sm:$0xff] (!%p184_p3)   ;;  %v1688_v14 = vld [vmem:[%s2037_s1 + $0x20] sm:$0xff] (!%p184_p3)   ;;  %v1691_v17 = vld [vmem:[%s2037_s1 + $0x28] sm:$0xff] (!%p184_p3)  }
   0xc   : > { %1445 = vmatpush3.bf16.msra.mxu0 (!%p184_p3), %v1679_v4  ;;  %v1693_v18 = vld [vmem:[%s2037_s1 + $0x70] sm:$0xff] (!%p184_p3)   ;;  %v1696_v21 = vld [vmem:[%s2037_s1 + $0x78] sm:$0xff] (!%p184_p3)   ;;  %v1747_v39 = vld [vmem:[%s2038_s2] sm:$0xff] (!%p184_p3)  }
   0xd   : > { %1446 = vmatprep.subr.bf16.mxu0 (!%p184_p3), %v1681_v6  ;;  %v1694_v19 = vld [vmem:[%s2037_s1 + $0x30] sm:$0xff] (!%p184_p3)   ;;  %v1698_v22 = vld [vmem:[%s2037_s1 + $0xb8] sm:$0xff] (!%p184_p3)   ;;  %v1748_v41 = vld [vmem:[%s2038_s2 + $0x8] sm:$0xff] (!%p184_p3)  }
   0xe   : > { %1573 = vmatpush3.bf16.msra.mxu1 %v1680_v5  ;;  %s2046_s7 = smov (!%p216_p4, %s214_s7), 47  ;;  %v1695_v20 = vld [vmem:[%s2037_s1 + $0xb0] sm:$0xff]   ;;  %v1697_v25 = vld [vmem:[%s2037_s1 + $0x38] sm:$0xff]   ;;  %v1751_v63 = vld [vmem:[%s2038_s2 + $0x20] sm:$0xff]  }
   0xf   : > { %1574 = vmatprep.subr.bf16.mxu1 %v1683_v8  ;;  %s1650_s5 = smul.u32 12, %s2046_s7  ;;  %v1749_v44 = vld [vmem:[%s2038_s2 + $0x10] sm:$0xff]   ;;  %v1750_v45 = vld [vmem:[%s2038_s2 + $0x18] sm:$0xff]   ;;  %v1752_v1 = vld [vmem:[%s2038_s2 + $0x28] sm:$0xff]  }
  0x10   : > { %1447 = vmatpush3.bf16.msra.mxu0 %v1682_v7  ;;  %v1753_v2 = vld [vmem:[%s2038_s2 + $0x30] sm:$0xff]   ;;  %v1754_v3 = vld [vmem:[%s2038_s2 + $0x38] sm:$0xff]  }
  0x11   : > { %1448 = vmatprep.subr.bf16.mxu0 %v1684_v9  ;;  %s1894_s20 = scalar_lea.vmem %s2036_s0, %s1650_s5 }
  0x12   : > { %1575 = vmatpush3.bf16.msra.mxu1 %v1683_v8  ;;  %v1701_v23 = vld [vmem:[%s1894_s20 + $0x4] ss:$12 sps:$4 sm:$0xff]   ;;  %v1702_v24 = vld [vmem:[%s1894_s20 + $0x8] ss:$12 sps:$4 sm:$0xff]   ;;  %v1699_v26 = vld [vmem:[%s1894_s20] ss:$12 sps:$4 sm:$0xff]  }
  0x13   : > { %1576 = vmatprep.subr.bf16.mxu1 %v1686_v11  ;;  %754 = vmatprep.mubr.bf16.mxu0 %v1701_v23  ;;  %v1704_v27 = vld [vmem:[%s1894_s20 + $0x1c] ss:$12 sps:$4 sm:$0xff]   ;;  %v1703_v28 = vld [vmem:[%s1894_s20 + $0x20] ss:$12 sps:$4 sm:$0xff]   ;;  %v1710_v29 = vld [vmem:[%s1894_s20 + $0x38] ss:$12 sps:$4 sm:$0xff]  }
  0x14   : > { %1449 = vmatpush3.bf16.msra.mxu0 %v1685_v10  ;;  %1586 = vmatprep.mubr.bf16.mxu1 %v1702_v24  ;;  %v1706_v30 = vld [vmem:[%s1894_s20 + $0x18] ss:$12 sps:$4 sm:$0xff]   ;;  %v1707_v31 = vld [vmem:[%s1894_s20 + $0x34] ss:$12 sps:$4 sm:$0xff]   ;;  %v1711_v32 = vld [vmem:[%s1894_s20 + $0x50] ss:$12 sps:$4 sm:$0xff]  }
  0x15   : > { %1450 = vmatprep.subr.bf16.mxu0 %v1687_v12  ;;  %v1718_v33 = vld [vmem:[%s1894_s20 + $0x68] ss:$12 sps:$4 sm:$0xff]   ;;  %v1709_v34 = vld [vmem:[%s1894_s20 + $0x30] ss:$12 sps:$4 sm:$0xff]   ;;  %v1712_v35 = vld [vmem:[%s1894_s20 + $0x4c] ss:$12 sps:$4 sm:$0xff]  }
  0x16   : > { %1577 = vmatpush3.bf16.msra.mxu1 %v1686_v11  ;;  %v1719_v36 = vld [vmem:[%s1894_s20 + $0x80] ss:$12 sps:$4 sm:$0xff]   ;;  %v1726_v37 = vld [vmem:[%s1894_s20 + $0x98] ss:$12 sps:$4 sm:$0xff]   ;;  %v1714_v38 = vld [vmem:[%s1894_s20 + $0x48] ss:$12 sps:$4 sm:$0xff]  }
  0x17   : > { %1578 = vmatprep.subr.bf16.mxu1 %v1689_v13  ;;  %v1715_v40 = vld [vmem:[%s1894_s20 + $0x64] ss:$12 sps:$4 sm:$0xff]   ;;  %v1734_v43 = vld [vmem:[%s1894_s20 + $0xc8] ss:$12 sps:$4 sm:$0xff]   ;;  %v1717_v46 = vld [vmem:[%s1894_s20 + $0x60] ss:$12 sps:$4 sm:$0xff]  }
  0x18   : > { %1451 = vmatpush3.bf16.msra.mxu0 %v1688_v14  ;;  %v1727_v42 = vld [vmem:[%s1894_s20 + $0xb0] ss:$12 sps:$4 sm:$0xff]   ;;  %v1735_v48 = vld [vmem:[%s1894_s20 + $0xe0] ss:$12 sps:$4 sm:$0xff]   ;;  %v1742_v49 = vld [vmem:[%s1894_s20 + $0xf8] ss:$12 sps:$4 sm:$0xff]  }
  0x19   : > { %1452 = vmatprep.subr.bf16.mxu0 %v1690_v15  ;;  %v1720_v47 = vld [vmem:[%s1894_s20 + $0x7c] ss:$12 sps:$4 sm:$0xff]   ;;  %v1722_v50 = vld [vmem:[%s1894_s20 + $0x78] ss:$12 sps:$4 sm:$0xff]   ;;  %v1723_v51 = vld [vmem:[%s1894_s20 + $0x94] ss:$12 sps:$4 sm:$0xff]  }
  0x1a   : > { %1579 = vmatpush3.bf16.msra.mxu1 %v1689_v13  ;;  %v1743_v52 = vld [vmem:[%s1894_s20 + $0x110] ss:$12 sps:$4 sm:$0xff]   ;;  %v1728_v54 = vld [vmem:[%s1894_s20 + $0xac] ss:$12 sps:$4 sm:$0xff]   ;;  %v1730_v55 = vld [vmem:[%s1894_s20 + $0xa8] ss:$12 sps:$4 sm:$0xff]  }
  0x1b   : > { %1580 = vmatprep.subr.bf16.mxu1 %v1692_v16  ;;  %v1725_v53 = vld [vmem:[%s1894_s20 + $0x90] ss:$12 sps:$4 sm:$0xff]   ;;  %v1733_v57 = vld [vmem:[%s1894_s20 + $0xc0] ss:$12 sps:$4 sm:$0xff]   ;;  %v1738_v59 = vld [vmem:[%s1894_s20 + $0xd8] ss:$12 sps:$4 sm:$0xff]  }
  0x1c   : > { %1453 = vmatpush3.bf16.msra.mxu0 %v1691_v17  ;;  %v1731_v56 = vld [vmem:[%s1894_s20 + $0xc4] ss:$12 sps:$4 sm:$0xff]   ;;  %v1736_v58 = vld [vmem:[%s1894_s20 + $0xdc] ss:$12 sps:$4 sm:$0xff]   ;;  %v1739_v60 = vld [vmem:[%s1894_s20 + $0xf4] ss:$12 sps:$4 sm:$0xff]  }
  0x1d   : > { %1454 = vmatprep.subr.bf16.mxu0 %v1693_v18  ;;  %v1741_v61 = vld [vmem:[%s1894_s20 + $0xf0] ss:$12 sps:$4 sm:$0xff]   ;;  %v1744_v62 = vld [vmem:[%s1894_s20 + $0x10c] ss:$12 sps:$4 sm:$0xff]   ;;  %v1746_v0 = vld [vmem:[%s1894_s20 + $0x108] ss:$12 sps:$4 sm:$0xff]  }
  0x1e   : > { %1581 = vmatpush3.bf16.msra.mxu1 %v1692_v16  ;;  %s1370_s20 = sshll.u32 %s2046_s7, 3 }
  0x1f   : > { %1582 = vmatprep.subr.bf16.mxu1 %v1695_v20  ;;  %s1977_s26 = scalar_lea.vmem %s2040_s4, %s1370_s20 }
  0x20   : > { %1455 = vmatpush3.bf16.msra.mxu0 %v1694_v19 }
  0x21   : > { %1456 = vmatprep.subr.bf16.mxu0 %v1696_v21 }
  0x22   : > { %1583 = vmatpush3.bf16.msra.mxu1 %v1695_v20 }
  0x23   : > { %1584 = vmatprep.subr.bf16.mxu1 %v1698_v22 }
  0x24   : > { %1457 = vmatpush3.bf16.msra.mxu0 %v1697_v25 }
  0x26   : > { %1585 = vmatpush3.bf16.msra.mxu1 %v1698_v22 }
  0x27   : > { %755 = vmatmul.mubr.bf16.vlgmr.msra.gmra.mrb[0].mxu0 %v1699_v26  ;;  %1610 = vmatprep.subr.bf16.mxu1 %v1747_v39 }
  0x28   : > { %762 = vmatprep.mubr.bf16.mxu0 %v1704_v27 }
  0x29   : > { %1587 = vmatmul.mubr.bf16.vlgmr.msra.gmra.mrb[0].mxu1 %v1703_v28 }
  0x2a   : > { %1590 = vmatprep.mubr.bf16.mxu1 %v1710_v29  ;;  %1611 = vmatpush3.bf16.msra.mxu1 %v1747_v39 }
  0x2b   : > { %1612 = vmatprep.subr.bf16.mxu1 %v1748_v41 }
  0x2e   : > { %1613 = vmatpush3.bf16.msra.mxu1 %v1748_v41 }
  0x2f   : > { %763 = vmatmul.mubr.bf16.gmra.mrb[4].mxu0 %v1706_v30  ;;  %1614 = vmatprep.subr.bf16.mxu1 %v1749_v44 }
  0x30   : > { %770 = vmatprep.mubr.bf16.mxu0 %v1707_v31 }
  0x31   : > { %1591 = vmatmul.mubr.bf16.gmra.mrb[4].mxu1 %v1711_v32 }
  0x32   : > { %1594 = vmatprep.mubr.bf16.mxu1 %v1718_v33  ;;  %1615 = vmatpush3.bf16.msra.mxu1 %v1749_v44 }
  0x33   : > { %1616 = vmatprep.subr.bf16.mxu1 %v1750_v45 }
  0x36   : > { %1617 = vmatpush3.bf16.msra.mxu1 %v1750_v45 }
  0x37   : > { %771 = vmatmul.mubr.bf16.gmra.mrb[8].mxu0 %v1709_v34  ;;  %1618 = vmatprep.subr.bf16.mxu1 %v1751_v63 }
  0x38   : > { %778 = vmatprep.mubr.bf16.mxu0 %v1712_v35 }
  0x39   : > { %1595 = vmatmul.mubr.bf16.gmra.mrb[8].mxu1 %v1719_v36 }
  0x3a   : > { %1598 = vmatprep.mubr.bf16.mxu1 %v1726_v37  ;;  %1619 = vmatpush3.bf16.msra.mxu1 %v1751_v63 }
  0x3b   : > { %1620 = vmatprep.subr.bf16.mxu1 %v1752_v1 }
  0x3e   : > { %1621 = vmatpush3.bf16.msra.mxu1 %v1752_v1 }
  0x3f   : > { %779 = vmatmul.mubr.bf16.gmra.mrb[12].mxu0 %v1714_v38  ;;  %1622 = vmatprep.subr.bf16.mxu1 %v1753_v2 }
  0x40   : > { %786 = vmatprep.mubr.bf16.mxu0 %v1715_v40 }
  0x41   : > { %1599 = vmatmul.mubr.bf16.gmra.mrb[12].mxu1 %v1727_v42 }
  0x42   : > { %1602 = vmatprep.mubr.bf16.mxu1 %v1734_v43  ;;  %1623 = vmatpush3.bf16.msra.mxu1 %v1753_v2 }
  0x43   : > { %1624 = vmatprep.subr.bf16.mxu1 %v1754_v3 }
  0x46   : > { %1625 = vmatpush3.bf16.msra.mxu1 %v1754_v3 }
  0x47   : > { %787 = vmatmul.mubr.bf16.gmra.mrb[16].mxu0 %v1717_v46 }
  0x48   : > { %794 = vmatprep.mubr.bf16.mxu0 %v1720_v47 }
  0x49   : > { %1603 = vmatmul.mubr.bf16.gmra.mrb[16].mxu1 %v1735_v48 }
  0x4a   : > { %1606 = vmatprep.mubr.bf16.mxu1 %v1742_v49 }
  0x4f   : > { %795 = vmatmul.mubr.bf16.gmra.mrb[20].mxu0 %v1722_v50 }
  0x50   : > { %802 = vmatprep.mubr.bf16.mxu0 %v1723_v51 }
  0x51   : > { %1607 = vmatmul.mubr.bf16.gmra.mrb[20].mxu1 %v1743_v52 }
  0x57   : > { %803 = vmatmul.mubr.bf16.gmra.mrb[24].mxu0 %v1725_v53 }
  0x58   : > { %810 = vmatprep.mubr.bf16.mxu0 %v1728_v54 }
  0x5f   : > { %811 = vmatmul.mubr.bf16.gmra.mrb[28].mxu0 %v1730_v55 }
  0x60   : > { %818 = vmatprep.mubr.bf16.mxu0 %v1731_v56 }
  0x67   : > { %819 = vmatmul.mubr.bf16.gmra.mrb[32].mxu0 %v1733_v57 }
  0x68   : > { %826 = vmatprep.mubr.bf16.mxu0 %v1736_v58 }
  0x6f   : > { %827 = vmatmul.mubr.bf16.gmra.mrb[36].mxu0 %v1738_v59 }
  0x70   : > { %834 = vmatprep.mubr.bf16.mxu0 %v1739_v60 }
  0x77   : > { %835 = vmatmul.mubr.bf16.gmra.mrb[40].mxu0 %v1741_v61 }
  0x78   : > { %842 = vmatprep.mubr.bf16.mxu0 %v1744_v62 }
  0x7f   : > { %843 = vmatmul.mubr.bf16.gmra.mrb[44].mxu0 %v1746_v0 }
  0xfa   : > { %v1458_v4 = vpop.f32.mrb[0].mxu0 }
  0xfb   : > { %v1459_v5 = vpop.f32.mrb[1].mxu0 }
  0xfc   : > { %v1460_v6 = vadd.f32 %v1459_v5, %v1458_v4  ;;  %v1461_v7 = vpop.f32.mrb[2].mxu0  ;;  %v1588_v8 = vpop.f32.mrb[0].mxu1 }
  0xfd   : > { %v1462_v9 = vpop.f32.mrb[3].mxu0  ;;  %v885_v10 = vpop.f32.mrb[1].mxu1 }
  0xfe   : > { %v1463_v11 = vadd.f32 %v1462_v9, %v1461_v7  ;;  %v886_v12 = vadd.f32 %v1460_v6, %v885_v10  ;;  %v1589_v13 = vpop.f32.mrb[2].mxu1 }
  0xff   : > { %v888_v14 = vpop.f32.mrb[3].mxu1 }
 0x100   : > { %v889_v15 = vadd.f32 %v1463_v11, %v888_v14 }
 0x102   : > { %v1055_v16 = vpack.c.bf16 %v889_v15, %v886_v12  ;;  %v1464_v17 = vpop.f32.mrb[4].mxu0 }
 0x103   : > { %v1465_v18 = vpop.f32.mrb[5].mxu0 }
 0x104   : > { %v1466_v19 = vadd.f32 %v1465_v18, %v1464_v17  ;;  %v1467_v20 = vpop.f32.mrb[6].mxu0  ;;  %1626 = vmatprep.mubr.bf16.mxu1 %v1055_v16  ;;  %v1592_v21 = vpop.f32.mrb[4].mxu1 }
 0x105   : > { %v1468_v22 = vpop.f32.mrb[7].mxu0  ;;  %v901_v23 = vpop.f32.mrb[5].mxu1 }
 0x106   : > { %v894_v24 = vadd.f32 %v1588_v8, %v1466_v19  ;;  %v1469_v25 = vadd.f32 %v1468_v22, %v1467_v20  ;;  %v1593_v26 = vpop.f32.mrb[6].mxu1 }
 0x107   : > { %v904_v27 = vpop.f32.mrb[7].mxu1 }
 0x108   : > { %v897_v28 = vadd.f32 %v1589_v13, %v1469_v25 }
 0x10a   : > { %v1056_v29 = vpack.c.bf16 %v897_v28, %v894_v24  ;;  %v1470_v30 = vpop.f32.mrb[8].mxu0 }
 0x10b   : > { %v1471_v31 = vpop.f32.mrb[9].mxu0 }
 0x10c   : > { %v1472_v32 = vadd.f32 %v1471_v31, %v1470_v30  ;;  %v1473_v33 = vpop.f32.mrb[10].mxu0  ;;  %1627 = vmatmul.mubr.bf16.vlgmr.msra.gmra.mrb[24].mxu1 %v1056_v29  ;;  %v1596_v34 = vpop.f32.mrb[8].mxu1 }
 0x10d   : > { %v1474_v35 = vpop.f32.mrb[11].mxu0  ;;  %v917_v36 = vpop.f32.mrb[9].mxu1 }
 0x10e   : > { %v1475_v37 = vadd.f32 %v1474_v35, %v1473_v33  ;;  %v902_v38 = vadd.f32 %v1472_v32, %v901_v23  ;;  %v1597_v39 = vpop.f32.mrb[10].mxu1 }
 0x10f   : > { %v920_v40 = vpop.f32.mrb[11].mxu1 }
 0x110   : > { %v905_v41 = vadd.f32 %v1475_v37, %v904_v27 }
 0x112   : > { %v1057_v42 = vpack.c.bf16 %v905_v41, %v902_v38  ;;  %v1476_v43 = vpop.f32.mrb[12].mxu0 }
 0x113   : > { %v1477_v44 = vpop.f32.mrb[13].mxu0 }
 0x114   : > { %v1478_v45 = vadd.f32 %v1477_v44, %v1476_v43  ;;  %v1479_v46 = vpop.f32.mrb[14].mxu0  ;;  %1630 = vmatprep.mubr.bf16.mxu1 %v1057_v42  ;;  %v1600_v47 = vpop.f32.mrb[12].mxu1 }
 0x115   : > { %v1480_v48 = vpop.f32.mrb[15].mxu0  ;;  %v933_v49 = vpop.f32.mrb[13].mxu1 }
 0x116   : > { %v910_v50 = vadd.f32 %v1592_v21, %v1478_v45  ;;  %v1481_v51 = vadd.f32 %v1480_v48, %v1479_v46  ;;  %v1601_v52 = vpop.f32.mrb[14].mxu1 }
 0x117   : > { %v936_v53 = vpop.f32.mrb[15].mxu1 }
 0x118   : > { %v913_v54 = vadd.f32 %v1593_v26, %v1481_v51 }
 0x11a   : > { %v1482_v55 = vpop.f32.mrb[16].mxu0  ;;  %v1058_v56 = vpack.c.bf16 %v913_v54, %v910_v50 }
 0x11b   : > { %v1483_v57 = vpop.f32.mrb[17].mxu0 }
 0x11c   : > { %v1484_v58 = vadd.f32 %v1483_v57, %v1482_v55  ;;  %v1485_v59 = vpop.f32.mrb[18].mxu0  ;;  %1631 = vmatmul.mubr.bf16.gmra.mrb[28].mxu1 %v1058_v56  ;;  %v1604_v60 = vpop.f32.mrb[16].mxu1 }
 0x11d   : > { %v1486_v61 = vpop.f32.mrb[19].mxu0  ;;  %v949_v62 = vpop.f32.mrb[17].mxu1 }
 0x11e   : > { %v1487_v63 = vadd.f32 %v1486_v61, %v1485_v59  ;;  %v918_v0 = vadd.f32 %v1484_v58, %v917_v36  ;;  %v1605_v1 = vpop.f32.mrb[18].mxu1 }
 0x11f   : > { %v952_v2 = vpop.f32.mrb[19].mxu1 }
 0x120   : > { %v921_v3 = vadd.f32 %v1487_v63, %v920_v40 }
 0x122   : > { %v1059_v4 = vpack.c.bf16 %v921_v3, %v918_v0  ;;  %v1488_v5 = vpop.f32.mrb[20].mxu0 }
 0x123   : > { %v1489_v6 = vpop.f32.mrb[21].mxu0 }
 0x124   : > { %v1490_v7 = vadd.f32 %v1489_v6, %v1488_v5  ;;  %v1491_v8 = vpop.f32.mrb[22].mxu0  ;;  %1634 = vmatprep.mubr.bf16.mxu1 %v1059_v4  ;;  %v1965_v9 = vpop.f32.mrb[20].mxu1 }
 0x125   : > { %v1492_v10 = vpop.f32.mrb[23].mxu0  ;;  %v965_v11 = vpop.f32.mrb[21].mxu1 }
 0x126   : > { %v926_v12 = vadd.f32 %v1596_v34, %v1490_v7  ;;  %v1493_v13 = vadd.f32 %v1492_v10, %v1491_v8  ;;  %v1609_v14 = vpop.f32.mrb[22].mxu1  ;;  %v1972_v8 = vld [vmem:[%s2039_s3] ss:$0 sm:$0xff] }
 0x127   : > { %v968_v15 = vpop.f32.mrb[23].mxu1 }
 0x128   : > { %v929_v16 = vadd.f32 %v1597_v39, %v1493_v13 }
 0x12a   : > { %v1494_v17 = vpop.f32.mrb[24].mxu0  ;;  %v1060_v18 = vpack.c.bf16 %v929_v16, %v926_v12 }
 0x12b   : > { %v1495_v19 = vpop.f32.mrb[25].mxu0 }
 0x12c   : > { %v1496_v20 = vadd.f32 %v1495_v19, %v1494_v17  ;;  %v1497_v21 = vpop.f32.mrb[26].mxu0  ;;  %1635 = vmatmul.mubr.bf16.gmra.mrb[32].mxu1 %v1060_v18 }
 0x12d   : > { %v1498_v22 = vpop.f32.mrb[27].mxu0 }
 0x12e   : > { %v1499_v23 = vadd.f32 %v1498_v22, %v1497_v21  ;;  %v934_v24 = vadd.f32 %v1496_v20, %v933_v49 }
 0x130   : > { %v937_v25 = vadd.f32 %v1499_v23, %v936_v53 }
 0x132   : > { %v1061_v26 = vpack.c.bf16 %v937_v25, %v934_v24  ;;  %v1500_v27 = vpop.f32.mrb[28].mxu0 }
 0x133   : > { %v1501_v28 = vpop.f32.mrb[29].mxu0 }
 0x134   : > { %v1502_v29 = vadd.f32 %v1501_v28, %v1500_v27  ;;  %v1503_v30 = vpop.f32.mrb[30].mxu0  ;;  %1638 = vmatprep.mubr.bf16.mxu1 %v1061_v26 }
 0x135   : > { %v1504_v31 = vpop.f32.mrb[31].mxu0 }
 0x136   : > { %v942_v32 = vadd.f32 %v1600_v47, %v1502_v29  ;;  %v1505_v33 = vadd.f32 %v1504_v31, %v1503_v30 }
 0x138   : > { %v945_v34 = vadd.f32 %v1601_v52, %v1505_v33 }
 0x13a   : > { %v1506_v35 = vpop.f32.mrb[32].mxu0  ;;  %v1062_v36 = vpack.c.bf16 %v945_v34, %v942_v32 }
 0x13b   : > { %v1507_v37 = vpop.f32.mrb[33].mxu0 }
 0x13c   : > { %v1508_v38 = vadd.f32 %v1507_v37, %v1506_v35  ;;  %v1509_v39 = vpop.f32.mrb[34].mxu0  ;;  %1639 = vmatmul.mubr.bf16.gmra.mrb[36].mxu1 %v1062_v36 }
 0x13d   : > { %v1510_v40 = vpop.f32.mrb[35].mxu0 }
 0x13e   : > { %v1511_v41 = vadd.f32 %v1510_v40, %v1509_v39  ;;  %v950_v42 = vadd.f32 %v1508_v38, %v949_v62 }
 0x140   : > { %v953_v43 = vadd.f32 %v1511_v41, %v952_v2 }
 0x142   : > { %v1063_v44 = vpack.c.bf16 %v953_v43, %v950_v42  ;;  %v1512_v45 = vpop.f32.mrb[36].mxu0 }
 0x143   : > { %v1513_v46 = vpop.f32.mrb[37].mxu0 }
 0x144   : > { %v1514_v48 = vadd.f32 %v1513_v46, %v1512_v45  ;;  %v1515_v49 = vpop.f32.mrb[38].mxu0  ;;  %1642 = vmatprep.mubr.bf16.mxu1 %v1063_v44 }
 0x145   : > { %v1516_v50 = vpop.f32.mrb[39].mxu0 }
 0x146   : > { %v958_v47 = vadd.f32 %v1604_v60, %v1514_v48  ;;  %v1517_v51 = vadd.f32 %v1516_v50, %v1515_v49 }
 0x148   : > { %v961_v52 = vadd.f32 %v1605_v1, %v1517_v51 }
 0x14a   : > { %v1518_v53 = vpop.f32.mrb[40].mxu0  ;;  %v1064_v54 = vpack.c.bf16 %v961_v52, %v958_v47 }
 0x14b   : > { %v1519_v55 = vpop.f32.mrb[41].mxu0 }
 0x14c   : > { %v1520_v56 = vadd.f32 %v1519_v55, %v1518_v53  ;;  %v1521_v57 = vpop.f32.mrb[42].mxu0  ;;  %1643 = vmatmul.mubr.bf16.gmra.mrb[40].mxu1 %v1064_v54 }
 0x14d   : > { %v1522_v58 = vpop.f32.mrb[43].mxu0 }
 0x14e   : > { %v1523_v59 = vadd.f32 %v1522_v58, %v1521_v57  ;;  %v966_v61 = vadd.f32 %v1520_v56, %v965_v11 }
 0x150   : > { %v969_v62 = vadd.f32 %v1523_v59, %v968_v15 }
 0x152   : > { %v1065_v63 = vpack.c.bf16 %v969_v62, %v966_v61  ;;  %v1524_v0 = vpop.f32.mrb[44].mxu0 }
 0x153   : > { %v1525_v2 = vpop.f32.mrb[45].mxu0 }
 0x154   : > { %v1526_v3 = vadd.f32 %v1525_v2, %v1524_v0  ;;  %v1527_v4 = vpop.f32.mrb[46].mxu0  ;;  %1646 = vmatprep.mubr.bf16.mxu1 %v1065_v63 }
 0x155   : > { %v1528_v60 = vpop.f32.mrb[47].mxu0 }
 0x156   : > { %v974_v1 = vadd.f32 %v1965_v9, %v1526_v3  ;;  %v1529_v5 = vadd.f32 %v1528_v60, %v1527_v4 }
 0x158   : > { %v977_v6 = vadd.f32 %v1609_v14, %v1529_v5 }
 0x15a   : > { %v1066_v7 = vpack.c.bf16 %v977_v6, %v974_v1 }
 0x15c   : > { %1647 = vmatmul.mubr.bf16.gmra.mrb[44].mxu1 %v1066_v7 }
 0x1df   : > { %v1628_v9 = vpop.f32.mrb[24].mxu1 }
 0x1e0   : > { %v1181_v10 = vadd.f32 %v1628_v9, %v1972_v8  ;;  %v1172_v11 = vpop.f32.mrb[25].mxu1 }
 0x1e1   : > { %v1173_v12 = vadd.f32 %v1972_v8, %v1172_v11  ;;  %v1629_v13 = vpop.f32.mrb[26].mxu1 }
 0x1e2   : > { %1269 = vst [vmem:[%s1977_s26 + $0x10] sm:$0xff] %v1181_v10  ;;  %v1184_v14 = vadd.f32 %v1629_v13, %v1972_v8  ;;  %v1175_v15 = vpop.f32.mrb[27].mxu1 }
 0x1e3   : > { %1267 = vst [vmem:[%s1977_s26] sm:$0xff] %v1173_v12  ;;  %v1176_v16 = vadd.f32 %v1972_v8, %v1175_v15 }
 0x1e4   : > { %1270 = vst [vmem:[%s1977_s26 + $0x18] sm:$0xff] %v1184_v14 }
 0x1e5   : > { %1268 = vst [vmem:[%s1977_s26 + $0x8] sm:$0xff] %v1176_v16 }
 0x1ef   : > { %v1632_v17 = vpop.f32.mrb[28].mxu1 }
 0x1f0   : > { %v1197_v18 = vadd.f32 %v1632_v17, %v1972_v8  ;;  %v1188_v19 = vpop.f32.mrb[29].mxu1 }
 0x1f1   : > { %v1189_v20 = vadd.f32 %v1972_v8, %v1188_v19  ;;  %v1633_v21 = vpop.f32.mrb[30].mxu1 }
 0x1f2   : > { %1273 = vst [vmem:[%s1977_s26 + $0x30] sm:$0xff] %v1197_v18  ;;  %v1200_v22 = vadd.f32 %v1633_v21, %v1972_v8  ;;  %v1191_v23 = vpop.f32.mrb[31].mxu1 }
 0x1f3   : > { %1271 = vst [vmem:[%s1977_s26 + $0x20] sm:$0xff] %v1189_v20  ;;  %v1192_v24 = vadd.f32 %v1972_v8, %v1191_v23 }
 0x1f4   : > { %1274 = vst [vmem:[%s1977_s26 + $0x38] sm:$0xff] %v1200_v22 }
 0x1f5   : > { %1272 = vst [vmem:[%s1977_s26 + $0x28] sm:$0xff] %v1192_v24 }
 0x1ff   : > { %v1636_v25 = vpop.f32.mrb[32].mxu1 }
 0x200   : > { %v1213_v26 = vadd.f32 %v1636_v25, %v1972_v8  ;;  %v1204_v27 = vpop.f32.mrb[33].mxu1 }
 0x201   : > { %v1205_v28 = vadd.f32 %v1972_v8, %v1204_v27  ;;  %v1637_v29 = vpop.f32.mrb[34].mxu1 }
 0x202   : > { %1277 = vst [vmem:[%s1977_s26 + $0x50] sm:$0xff] %v1213_v26  ;;  %v1216_v30 = vadd.f32 %v1637_v29, %v1972_v8  ;;  %v1207_v31 = vpop.f32.mrb[35].mxu1 }
 0x203   : > { %1275 = vst [vmem:[%s1977_s26 + $0x40] sm:$0xff] %v1205_v28  ;;  %v1208_v32 = vadd.f32 %v1972_v8, %v1207_v31 }
 0x204   : > { %1278 = vst [vmem:[%s1977_s26 + $0x58] sm:$0xff] %v1216_v30 }
 0x205   : > { %1276 = vst [vmem:[%s1977_s26 + $0x48] sm:$0xff] %v1208_v32 }
 0x20f   : > { %v1640_v33 = vpop.f32.mrb[36].mxu1 }
 0x210   : > { %v1229_v34 = vadd.f32 %v1640_v33, %v1972_v8  ;;  %v1220_v35 = vpop.f32.mrb[37].mxu1 }
 0x211   : > { %v1221_v36 = vadd.f32 %v1972_v8, %v1220_v35  ;;  %v1641_v37 = vpop.f32.mrb[38].mxu1 }
 0x212   : > { %1281 = vst [vmem:[%s1977_s26 + $0x70] sm:$0xff] %v1229_v34  ;;  %v1232_v38 = vadd.f32 %v1641_v37, %v1972_v8  ;;  %v1223_v39 = vpop.f32.mrb[39].mxu1 }
 0x213   : > { %1279 = vst [vmem:[%s1977_s26 + $0x60] sm:$0xff] %v1221_v36  ;;  %v1224_v40 = vadd.f32 %v1972_v8, %v1223_v39 }
 0x214   : > { %1282 = vst [vmem:[%s1977_s26 + $0x78] sm:$0xff] %v1232_v38 }
 0x215   : > { %1280 = vst [vmem:[%s1977_s26 + $0x68] sm:$0xff] %v1224_v40 }
 0x21f   : > { %v1644_v41 = vpop.f32.mrb[40].mxu1 }
 0x220   : > { %v1245_v42 = vadd.f32 %v1644_v41, %v1972_v8  ;;  %v1236_v43 = vpop.f32.mrb[41].mxu1 }
 0x221   : > { %v1237_v44 = vadd.f32 %v1972_v8, %v1236_v43  ;;  %v1645_v45 = vpop.f32.mrb[42].mxu1 }
 0x222   : > { %1285 = vst [vmem:[%s1977_s26 + $0x90] sm:$0xff] %v1245_v42  ;;  %v1248_v46 = vadd.f32 %v1645_v45, %v1972_v8  ;;  %v1239_v48 = vpop.f32.mrb[43].mxu1 }
 0x223   : > { %1283 = vst [vmem:[%s1977_s26 + $0x80] sm:$0xff] %v1237_v44  ;;  %v1240_v49 = vadd.f32 %v1972_v8, %v1239_v48 }
 0x224   : > { %1286 = vst [vmem:[%s1977_s26 + $0x98] sm:$0xff] %v1248_v46 }
 0x225   : > { %1284 = vst [vmem:[%s1977_s26 + $0x88] sm:$0xff] %v1240_v49 }
 0x22f   : > { %v1648_v50 = vpop.f32.mrb[44].mxu1 }
 0x230   : > { %v1261_v47 = vadd.f32 %v1648_v50, %v1972_v8  ;;  %v1252_v51 = vpop.f32.mrb[45].mxu1 }
 0x231   : > { %v1253_v52 = vadd.f32 %v1972_v8, %v1252_v51  ;;  %v1649_v53 = vpop.f32.mrb[46].mxu1 }
 0x232   : > { %1289 = vst [vmem:[%s1977_s26 + $0xb0] sm:$0xff] %v1261_v47  ;;  %v1264_v54 = vadd.f32 %v1649_v53, %v1972_v8  ;;  %v1255_v55 = vpop.f32.mrb[47].mxu1 }
 0x233   : > { %1287 = vst [vmem:[%s1977_s26 + $0xa0] sm:$0xff] %v1253_v52  ;;  %v1256_v56 = vadd.f32 %v1972_v8, %v1255_v55 }
 0x234   : > { %1290 = vst [vmem:[%s1977_s26 + $0xb8] sm:$0xff] %v1264_v54 }
 0x235   : > { %1288 = vst [vmem:[%s1977_s26 + $0xa8] sm:$0xff] %v1256_v56 }
 0x236 PF: > { %s14_s17 = sadd.s32 1, %s1777_s17   ;;  %s2041_s15 = smov %s1773_s16 }
 0x237   : > { %p11_p5 = scmp.ge.s32.totalorder %s14_s17, 4   ;;  %s2042_s16 = smov %s2044_s18 }
 0x239   :  { %13 = sbr.rel (!%p11_p5) target bundleno = 2 (0x2), region = 75 }

// kernel: gcn_forward.2
= control target key start
LH: loop header
LB: loop body
LE: loop exit
PB: predicated region body
PF: predicated region fallthrough
CT: control target
= control target key end

     0   :  { %s2043_s15 = smov 0   ;;  %s2045_s16 = smov 0   ;;  %s2263_s0 = inlined_call_operand.vmem [shape: bf16[384,384], index: 0, kind: input, shape index: {}]   ;;  %s2264_s1 = inlined_call_operand.vmem [shape: bf16[384,128], index: 1, kind: input, shape index: {}]   ;;  %s2265_s2 = inlined_call_operand.vmem [shape: bf16[128,128], index: 2, kind: input, shape index: {}]   ;;  %s2266_s3 = inlined_call_operand.vmem [shape: f32[1,128], index: 3, kind: input, shape index: {}]   ;;  %s2267_s4 = inlined_call_operand.vmem [shape: bf16[384,128], index: 4, kind: output, shape index: {}]  }
   0x1   :  { %s2047_s17 = smov 0  }
   0x2 LB: > { %s26_s18 = sadd.s32 1, %s2012_s16  ;;  %p1488_p0 = scmp.ge.s32.totalorder %s2016_s17, 1  ;;  %s2016_s17 = sphi %s2047_s17, %s14_s17   ;;  %s2012_s16 = sphi %s2045_s16, %s2269_s16   ;;  %s2008_s15 = sphi %s2043_s15, %s2268_s15  }
   0x3   : > { %p28_p1 = scmp.ge.s32.totalorder %s26_s18, 2  ;;  %p183_p2 = scmp.lt.s32.totalorder %s2016_s17, 3 }
   0x5   : > { %s2271_s18 = smov (%p28_p1, %s26_s18), 0  ;;  %p184_p3 = pnand %p1488_p0, %p183_p2 }
   0x6   : > { %v1914_v0 = vld [vmem:[%s2264_s1 + $0x40] sm:$0xff] (!%p184_p3)   ;;  %v1917_v3 = vld [vmem:[%s2264_s1 + $0x48] sm:$0xff] (!%p184_p3)   ;;  %v1920_v6 = vld [vmem:[%s2264_s1 + $0x50] sm:$0xff] (!%p184_p3)   ;;  %s214_s7 = smul.u32 (!%p184_p3), 24, %s2008_s15 }
   0x7   : > { %187 = sbr.rel (%p184_p3) target bundleno = 570 (0x23a), region = 36  ;;  %v1915_v1 = vld [vmem:[%s2264_s1] sm:$0xff] (!%p184_p3)   ;;  %1681 = vmatprep.subr.bf16.mxu0 (!%p184_p3), %v1914_v0  ;;  %v1918_v4 = vld [vmem:[%s2264_s1 + $0x8] sm:$0xff] (!%p184_p3)   ;;  %v1921_v7 = vld [vmem:[%s2264_s1 + $0x10] sm:$0xff] (!%p184_p3)  }
   0x8   : > { %v1916_v2 = vld [vmem:[%s2264_s1 + $0x80] sm:$0xff] (!%p184_p3)   ;;  %1682 = vmatpush3.bf16.msra.mxu0 (!%p184_p3), %v1915_v1  ;;  %v1919_v5 = vld [vmem:[%s2264_s1 + $0x88] sm:$0xff] (!%p184_p3)   ;;  %v1922_v8 = vld [vmem:[%s2264_s1 + $0x90] sm:$0xff] (!%p184_p3)   ;;  %p216_p4 = scmp.lt.s32.totalorder (!%p184_p3), %s214_s7, 47 }
   0x9   : > { %1809 = vmatprep.subr.bf16.mxu1 (!%p184_p3), %v1916_v2  ;;  %1683 = vmatprep.subr.bf16.mxu0 (!%p184_p3), %v1917_v3  ;;  %v1923_v9 = vld [vmem:[%s2264_s1 + $0x58] sm:$0xff] (!%p184_p3)   ;;  %v1926_v12 = vld [vmem:[%s2264_s1 + $0x60] sm:$0xff] (!%p184_p3)   ;;  %v1929_v15 = vld [vmem:[%s2264_s1 + $0x68] sm:$0xff] (!%p184_p3)  }
   0xa   : > { %1810 = vmatpush3.bf16.msra.mxu1 (!%p184_p3), %v1916_v2  ;;  %v1924_v10 = vld [vmem:[%s2264_s1 + $0x18] sm:$0xff] (!%p184_p3)   ;;  %v1928_v13 = vld [vmem:[%s2264_s1 + $0xa0] sm:$0xff] (!%p184_p3)   ;;  %v1931_v16 = vld [vmem:[%s2264_s1 + $0xa8] sm:$0xff] (!%p184_p3)  }
   0xb   : > { %1811 = vmatprep.subr.bf16.mxu1 (!%p184_p3), %v1919_v5  ;;  %v1925_v11 = vld [vmem:[%s2264_s1 + $0x98] sm:$0xff] (!%p184_p3)   ;;  %v1927_v14 = vld [vmem:[%s2264_s1 + $0x20] sm:$0xff] (!%p184_p3)   ;;  %v1930_v17 = vld [vmem:[%s2264_s1 + $0x28] sm:$0xff] (!%p184_p3)  }
   0xc   : > { %1684 = vmatpush3.bf16.msra.mxu0 (!%p184_p3), %v1918_v4  ;;  %v1932_v18 = vld [vmem:[%s2264_s1 + $0x70] sm:$0xff] (!%p184_p3)   ;;  %v1935_v21 = vld [vmem:[%s2264_s1 + $0x78] sm:$0xff] (!%p184_p3)   ;;  %v1986_v39 = vld [vmem:[%s2265_s2] sm:$0xff] (!%p184_p3)  }
   0xd   : > { %1685 = vmatprep.subr.bf16.mxu0 (!%p184_p3), %v1920_v6  ;;  %v1933_v19 = vld [vmem:[%s2264_s1 + $0x30] sm:$0xff] (!%p184_p3)   ;;  %v1937_v22 = vld [vmem:[%s2264_s1 + $0xb8] sm:$0xff] (!%p184_p3)   ;;  %v1987_v41 = vld [vmem:[%s2265_s2 + $0x8] sm:$0xff] (!%p184_p3)  }
   0xe   : > { %1812 = vmatpush3.bf16.msra.mxu1 %v1919_v5  ;;  %s2273_s7 = smov (!%p216_p4, %s214_s7), 47  ;;  %v1934_v20 = vld [vmem:[%s2264_s1 + $0xb0] sm:$0xff]   ;;  %v1936_v25 = vld [vmem:[%s2264_s1 + $0x38] sm:$0xff]   ;;  %v1990_v63 = vld [vmem:[%s2265_s2 + $0x20] sm:$0xff]  }
   0xf   : > { %1813 = vmatprep.subr.bf16.mxu1 %v1922_v8  ;;  %s1889_s5 = smul.u32 12, %s2273_s7  ;;  %v1988_v44 = vld [vmem:[%s2265_s2 + $0x10] sm:$0xff]   ;;  %v1989_v45 = vld [vmem:[%s2265_s2 + $0x18] sm:$0xff]   ;;  %v1991_v1 = vld [vmem:[%s2265_s2 + $0x28] sm:$0xff]   ;;  %s1490_s23 = sshll.u32 %s2273_s7, 2 }
  0x10   : > { %1686 = vmatpush3.bf16.msra.mxu0 %v1921_v7  ;;  %v1992_v2 = vld [vmem:[%s2265_s2 + $0x30] sm:$0xff]   ;;  %v1993_v3 = vld [vmem:[%s2265_s2 + $0x38] sm:$0xff]   ;;  %s2220_s26 = scalar_lea.vmem %s2267_s4, %s1490_s23 }
  0x11   : > { %1687 = vmatprep.subr.bf16.mxu0 %v1923_v9  ;;  %s2133_s20 = scalar_lea.vmem %s2263_s0, %s1889_s5 }
  0x12   : > { %1814 = vmatpush3.bf16.msra.mxu1 %v1922_v8  ;;  %v1940_v23 = vld [vmem:[%s2133_s20 + $0x4] ss:$12 sps:$4 sm:$0xff]   ;;  %v1941_v24 = vld [vmem:[%s2133_s20 + $0x8] ss:$12 sps:$4 sm:$0xff]   ;;  %v1938_v26 = vld [vmem:[%s2133_s20] ss:$12 sps:$4 sm:$0xff]  }
  0x13   : > { %1815 = vmatprep.subr.bf16.mxu1 %v1925_v11  ;;  %754 = vmatprep.mubr.bf16.mxu0 %v1940_v23  ;;  %v1943_v27 = vld [vmem:[%s2133_s20 + $0x1c] ss:$12 sps:$4 sm:$0xff]   ;;  %v1942_v28 = vld [vmem:[%s2133_s20 + $0x20] ss:$12 sps:$4 sm:$0xff]   ;;  %v1949_v29 = vld [vmem:[%s2133_s20 + $0x38] ss:$12 sps:$4 sm:$0xff]  }
  0x14   : > { %1688 = vmatpush3.bf16.msra.mxu0 %v1924_v10  ;;  %1825 = vmatprep.mubr.bf16.mxu1 %v1941_v24  ;;  %v1945_v30 = vld [vmem:[%s2133_s20 + $0x18] ss:$12 sps:$4 sm:$0xff]   ;;  %v1946_v31 = vld [vmem:[%s2133_s20 + $0x34] ss:$12 sps:$4 sm:$0xff]   ;;  %v1950_v32 = vld [vmem:[%s2133_s20 + $0x50] ss:$12 sps:$4 sm:$0xff]  }
  0x15   : > { %1689 = vmatprep.subr.bf16.mxu0 %v1926_v12  ;;  %v1957_v33 = vld [vmem:[%s2133_s20 + $0x68] ss:$12 sps:$4 sm:$0xff]   ;;  %v1948_v34 = vld [vmem:[%s2133_s20 + $0x30] ss:$12 sps:$4 sm:$0xff]   ;;  %v1951_v35 = vld [vmem:[%s2133_s20 + $0x4c] ss:$12 sps:$4 sm:$0xff]  }
  0x16   : > { %1816 = vmatpush3.bf16.msra.mxu1 %v1925_v11  ;;  %v1958_v36 = vld [vmem:[%s2133_s20 + $0x80] ss:$12 sps:$4 sm:$0xff]   ;;  %v1965_v37 = vld [vmem:[%s2133_s20 + $0x98] ss:$12 sps:$4 sm:$0xff]   ;;  %v1953_v38 = vld [vmem:[%s2133_s20 + $0x48] ss:$12 sps:$4 sm:$0xff]  }
  0x17   : > { %1817 = vmatprep.subr.bf16.mxu1 %v1928_v13  ;;  %v1954_v40 = vld [vmem:[%s2133_s20 + $0x64] ss:$12 sps:$4 sm:$0xff]   ;;  %v1973_v43 = vld [vmem:[%s2133_s20 + $0xc8] ss:$12 sps:$4 sm:$0xff]   ;;  %v1956_v46 = vld [vmem:[%s2133_s20 + $0x60] ss:$12 sps:$4 sm:$0xff]  }
  0x18   : > { %1690 = vmatpush3.bf16.msra.mxu0 %v1927_v14  ;;  %v1966_v42 = vld [vmem:[%s2133_s20 + $0xb0] ss:$12 sps:$4 sm:$0xff]   ;;  %v1974_v48 = vld [vmem:[%s2133_s20 + $0xe0] ss:$12 sps:$4 sm:$0xff]   ;;  %v1981_v49 = vld [vmem:[%s2133_s20 + $0xf8] ss:$12 sps:$4 sm:$0xff]  }
  0x19   : > { %1691 = vmatprep.subr.bf16.mxu0 %v1929_v15  ;;  %v1959_v47 = vld [vmem:[%s2133_s20 + $0x7c] ss:$12 sps:$4 sm:$0xff]   ;;  %v1961_v50 = vld [vmem:[%s2133_s20 + $0x78] ss:$12 sps:$4 sm:$0xff]   ;;  %v1962_v51 = vld [vmem:[%s2133_s20 + $0x94] ss:$12 sps:$4 sm:$0xff]  }
  0x1a   : > { %1818 = vmatpush3.bf16.msra.mxu1 %v1928_v13  ;;  %v1982_v52 = vld [vmem:[%s2133_s20 + $0x110] ss:$12 sps:$4 sm:$0xff]   ;;  %v1967_v54 = vld [vmem:[%s2133_s20 + $0xac] ss:$12 sps:$4 sm:$0xff]   ;;  %v1969_v55 = vld [vmem:[%s2133_s20 + $0xa8] ss:$12 sps:$4 sm:$0xff]  }
  0x1b   : > { %1819 = vmatprep.subr.bf16.mxu1 %v1931_v16  ;;  %v1964_v53 = vld [vmem:[%s2133_s20 + $0x90] ss:$12 sps:$4 sm:$0xff]   ;;  %v1972_v57 = vld [vmem:[%s2133_s20 + $0xc0] ss:$12 sps:$4 sm:$0xff]   ;;  %v1977_v59 = vld [vmem:[%s2133_s20 + $0xd8] ss:$12 sps:$4 sm:$0xff]  }
  0x1c   : > { %1692 = vmatpush3.bf16.msra.mxu0 %v1930_v17  ;;  %v1970_v56 = vld [vmem:[%s2133_s20 + $0xc4] ss:$12 sps:$4 sm:$0xff]   ;;  %v1975_v58 = vld [vmem:[%s2133_s20 + $0xdc] ss:$12 sps:$4 sm:$0xff]   ;;  %v1978_v60 = vld [vmem:[%s2133_s20 + $0xf4] ss:$12 sps:$4 sm:$0xff]  }
  0x1d   : > { %1693 = vmatprep.subr.bf16.mxu0 %v1932_v18  ;;  %v1980_v61 = vld [vmem:[%s2133_s20 + $0xf0] ss:$12 sps:$4 sm:$0xff]   ;;  %v1983_v62 = vld [vmem:[%s2133_s20 + $0x10c] ss:$12 sps:$4 sm:$0xff]   ;;  %v1985_v0 = vld [vmem:[%s2133_s20 + $0x108] ss:$12 sps:$4 sm:$0xff]  }
  0x1e   : > { %1820 = vmatpush3.bf16.msra.mxu1 %v1931_v16 }
  0x1f   : > { %1821 = vmatprep.subr.bf16.mxu1 %v1934_v20 }
  0x20   : > { %1694 = vmatpush3.bf16.msra.mxu0 %v1933_v19 }
  0x21   : > { %1695 = vmatprep.subr.bf16.mxu0 %v1935_v21 }
  0x22   : > { %1822 = vmatpush3.bf16.msra.mxu1 %v1934_v20 }
  0x23   : > { %1823 = vmatprep.subr.bf16.mxu1 %v1937_v22 }
  0x24   : > { %1696 = vmatpush3.bf16.msra.mxu0 %v1936_v25 }
  0x26   : > { %1824 = vmatpush3.bf16.msra.mxu1 %v1937_v22 }
  0x27   : > { %755 = vmatmul.mubr.bf16.vlgmr.msra.gmra.mrb[0].mxu0 %v1938_v26  ;;  %1849 = vmatprep.subr.bf16.mxu1 %v1986_v39 }
  0x28   : > { %762 = vmatprep.mubr.bf16.mxu0 %v1943_v27 }
  0x29   : > { %1826 = vmatmul.mubr.bf16.vlgmr.msra.gmra.mrb[0].mxu1 %v1942_v28 }
  0x2a   : > { %1829 = vmatprep.mubr.bf16.mxu1 %v1949_v29  ;;  %1850 = vmatpush3.bf16.msra.mxu1 %v1986_v39 }
  0x2b   : > { %1851 = vmatprep.subr.bf16.mxu1 %v1987_v41 }
  0x2e   : > { %1852 = vmatpush3.bf16.msra.mxu1 %v1987_v41 }
  0x2f   : > { %763 = vmatmul.mubr.bf16.gmra.mrb[4].mxu0 %v1945_v30  ;;  %1853 = vmatprep.subr.bf16.mxu1 %v1988_v44 }
  0x30   : > { %770 = vmatprep.mubr.bf16.mxu0 %v1946_v31 }
  0x31   : > { %1830 = vmatmul.mubr.bf16.gmra.mrb[4].mxu1 %v1950_v32 }
  0x32   : > { %1833 = vmatprep.mubr.bf16.mxu1 %v1957_v33  ;;  %1854 = vmatpush3.bf16.msra.mxu1 %v1988_v44 }
  0x33   : > { %1855 = vmatprep.subr.bf16.mxu1 %v1989_v45 }
  0x36   : > { %1856 = vmatpush3.bf16.msra.mxu1 %v1989_v45 }
  0x37   : > { %771 = vmatmul.mubr.bf16.gmra.mrb[8].mxu0 %v1948_v34  ;;  %1857 = vmatprep.subr.bf16.mxu1 %v1990_v63 }
  0x38   : > { %778 = vmatprep.mubr.bf16.mxu0 %v1951_v35 }
  0x39   : > { %1834 = vmatmul.mubr.bf16.gmra.mrb[8].mxu1 %v1958_v36 }
  0x3a   : > { %1837 = vmatprep.mubr.bf16.mxu1 %v1965_v37  ;;  %1858 = vmatpush3.bf16.msra.mxu1 %v1990_v63 }
  0x3b   : > { %1859 = vmatprep.subr.bf16.mxu1 %v1991_v1 }
  0x3e   : > { %1860 = vmatpush3.bf16.msra.mxu1 %v1991_v1 }
  0x3f   : > { %779 = vmatmul.mubr.bf16.gmra.mrb[12].mxu0 %v1953_v38  ;;  %1861 = vmatprep.subr.bf16.mxu1 %v1992_v2 }
  0x40   : > { %786 = vmatprep.mubr.bf16.mxu0 %v1954_v40 }
  0x41   : > { %1838 = vmatmul.mubr.bf16.gmra.mrb[12].mxu1 %v1966_v42 }
  0x42   : > { %1841 = vmatprep.mubr.bf16.mxu1 %v1973_v43  ;;  %1862 = vmatpush3.bf16.msra.mxu1 %v1992_v2 }
  0x43   : > { %1863 = vmatprep.subr.bf16.mxu1 %v1993_v3 }
  0x46   : > { %1864 = vmatpush3.bf16.msra.mxu1 %v1993_v3 }
  0x47   : > { %787 = vmatmul.mubr.bf16.gmra.mrb[16].mxu0 %v1956_v46 }
  0x48   : > { %794 = vmatprep.mubr.bf16.mxu0 %v1959_v47 }
  0x49   : > { %1842 = vmatmul.mubr.bf16.gmra.mrb[16].mxu1 %v1974_v48 }
  0x4a   : > { %1845 = vmatprep.mubr.bf16.mxu1 %v1981_v49 }
  0x4f   : > { %795 = vmatmul.mubr.bf16.gmra.mrb[20].mxu0 %v1961_v50 }
  0x50   : > { %802 = vmatprep.mubr.bf16.mxu0 %v1962_v51 }
  0x51   : > { %1846 = vmatmul.mubr.bf16.gmra.mrb[20].mxu1 %v1982_v52 }
  0x57   : > { %803 = vmatmul.mubr.bf16.gmra.mrb[24].mxu0 %v1964_v53 }
  0x58   : > { %810 = vmatprep.mubr.bf16.mxu0 %v1967_v54 }
  0x5f   : > { %811 = vmatmul.mubr.bf16.gmra.mrb[28].mxu0 %v1969_v55 }
  0x60   : > { %818 = vmatprep.mubr.bf16.mxu0 %v1970_v56 }
  0x67   : > { %819 = vmatmul.mubr.bf16.gmra.mrb[32].mxu0 %v1972_v57 }
  0x68   : > { %826 = vmatprep.mubr.bf16.mxu0 %v1975_v58 }
  0x6f   : > { %827 = vmatmul.mubr.bf16.gmra.mrb[36].mxu0 %v1977_v59 }
  0x70   : > { %834 = vmatprep.mubr.bf16.mxu0 %v1978_v60 }
  0x77   : > { %835 = vmatmul.mubr.bf16.gmra.mrb[40].mxu0 %v1980_v61 }
  0x78   : > { %842 = vmatprep.mubr.bf16.mxu0 %v1983_v62 }
  0x7f   : > { %843 = vmatmul.mubr.bf16.gmra.mrb[44].mxu0 %v1985_v0 }
  0xfa   : > { %v1697_v4 = vpop.f32.mrb[0].mxu0 }
  0xfb   : > { %v1698_v5 = vpop.f32.mrb[1].mxu0 }
  0xfc   : > { %v1699_v6 = vadd.f32 %v1698_v5, %v1697_v4  ;;  %v1700_v7 = vpop.f32.mrb[2].mxu0  ;;  %v1827_v8 = vpop.f32.mrb[0].mxu1 }
  0xfd   : > { %v1701_v9 = vpop.f32.mrb[3].mxu0  ;;  %v885_v10 = vpop.f32.mrb[1].mxu1 }
  0xfe   : > { %v1702_v11 = vadd.f32 %v1701_v9, %v1700_v7  ;;  %v886_v12 = vadd.f32 %v1699_v6, %v885_v10  ;;  %v1828_v13 = vpop.f32.mrb[2].mxu1 }
  0xff   : > { %v888_v14 = vpop.f32.mrb[3].mxu1 }
 0x100   : > { %v889_v15 = vadd.f32 %v1702_v11, %v888_v14 }
 0x102   : > { %v1055_v16 = vpack.c.bf16 %v889_v15, %v886_v12  ;;  %v1703_v17 = vpop.f32.mrb[4].mxu0 }
 0x103   : > { %v1704_v18 = vpop.f32.mrb[5].mxu0 }
 0x104   : > { %v1705_v19 = vadd.f32 %v1704_v18, %v1703_v17  ;;  %v1706_v20 = vpop.f32.mrb[6].mxu0  ;;  %1865 = vmatprep.mubr.bf16.mxu1 %v1055_v16  ;;  %v1831_v21 = vpop.f32.mrb[4].mxu1 }
 0x105   : > { %v1707_v22 = vpop.f32.mrb[7].mxu0  ;;  %v901_v23 = vpop.f32.mrb[5].mxu1 }
 0x106   : > { %v894_v24 = vadd.f32 %v1827_v8, %v1705_v19  ;;  %v1708_v25 = vadd.f32 %v1707_v22, %v1706_v20  ;;  %v1832_v26 = vpop.f32.mrb[6].mxu1 }
 0x107   : > { %v904_v27 = vpop.f32.mrb[7].mxu1 }
 0x108   : > { %v897_v28 = vadd.f32 %v1828_v13, %v1708_v25 }
 0x10a   : > { %v1056_v29 = vpack.c.bf16 %v897_v28, %v894_v24  ;;  %v1709_v30 = vpop.f32.mrb[8].mxu0 }
 0x10b   : > { %v1710_v31 = vpop.f32.mrb[9].mxu0 }
 0x10c   : > { %v1711_v32 = vadd.f32 %v1710_v31, %v1709_v30  ;;  %v1712_v33 = vpop.f32.mrb[10].mxu0  ;;  %1866 = vmatmul.mubr.bf16.vlgmr.msra.gmra.mrb[24].mxu1 %v1056_v29  ;;  %v1835_v34 = vpop.f32.mrb[8].mxu1 }
 0x10d   : > { %v1713_v35 = vpop.f32.mrb[11].mxu0  ;;  %v917_v36 = vpop.f32.mrb[9].mxu1 }
 0x10e   : > { %v1714_v37 = vadd.f32 %v1713_v35, %v1712_v33  ;;  %v902_v38 = vadd.f32 %v1711_v32, %v901_v23  ;;  %v1836_v39 = vpop.f32.mrb[10].mxu1 }
 0x10f   : > { %v920_v40 = vpop.f32.mrb[11].mxu1 }
 0x110   : > { %v905_v41 = vadd.f32 %v1714_v37, %v904_v27 }
 0x112   : > { %v1057_v42 = vpack.c.bf16 %v905_v41, %v902_v38  ;;  %v1715_v43 = vpop.f32.mrb[12].mxu0 }
 0x113   : > { %v1716_v44 = vpop.f32.mrb[13].mxu0 }
 0x114   : > { %v1717_v45 = vadd.f32 %v1716_v44, %v1715_v43  ;;  %v1718_v46 = vpop.f32.mrb[14].mxu0  ;;  %1869 = vmatprep.mubr.bf16.mxu1 %v1057_v42  ;;  %v1839_v47 = vpop.f32.mrb[12].mxu1 }
 0x115   : > { %v1719_v48 = vpop.f32.mrb[15].mxu0  ;;  %v933_v49 = vpop.f32.mrb[13].mxu1 }
 0x116   : > { %v910_v50 = vadd.f32 %v1831_v21, %v1717_v45  ;;  %v1720_v51 = vadd.f32 %v1719_v48, %v1718_v46  ;;  %v1840_v52 = vpop.f32.mrb[14].mxu1 }
 0x117   : > { %v936_v53 = vpop.f32.mrb[15].mxu1 }
 0x118   : > { %v913_v54 = vadd.f32 %v1832_v26, %v1720_v51 }
 0x11a   : > { %v1721_v55 = vpop.f32.mrb[16].mxu0  ;;  %v1058_v56 = vpack.c.bf16 %v913_v54, %v910_v50 }
 0x11b   : > { %v1722_v57 = vpop.f32.mrb[17].mxu0 }
 0x11c   : > { %v1723_v58 = vadd.f32 %v1722_v57, %v1721_v55  ;;  %v1724_v59 = vpop.f32.mrb[18].mxu0  ;;  %1870 = vmatmul.mubr.bf16.gmra.mrb[28].mxu1 %v1058_v56  ;;  %v1843_v60 = vpop.f32.mrb[16].mxu1 }
 0x11d   : > { %v1725_v61 = vpop.f32.mrb[19].mxu0  ;;  %v949_v62 = vpop.f32.mrb[17].mxu1 }
 0x11e   : > { %v1726_v63 = vadd.f32 %v1725_v61, %v1724_v59  ;;  %v918_v0 = vadd.f32 %v1723_v58, %v917_v36  ;;  %v1844_v1 = vpop.f32.mrb[18].mxu1 }
 0x11f   : > { %v952_v2 = vpop.f32.mrb[19].mxu1 }
 0x120   : > { %v921_v3 = vadd.f32 %v1726_v63, %v920_v40 }
 0x122   : > { %v1059_v4 = vpack.c.bf16 %v921_v3, %v918_v0  ;;  %v1727_v5 = vpop.f32.mrb[20].mxu0 }
 0x123   : > { %v1728_v6 = vpop.f32.mrb[21].mxu0 }
 0x124   : > { %v1729_v7 = vadd.f32 %v1728_v6, %v1727_v5  ;;  %v1730_v8 = vpop.f32.mrb[22].mxu0  ;;  %1873 = vmatprep.mubr.bf16.mxu1 %v1059_v4  ;;  %v2204_v9 = vpop.f32.mrb[20].mxu1 }
 0x125   : > { %v1731_v10 = vpop.f32.mrb[23].mxu0  ;;  %v965_v11 = vpop.f32.mrb[21].mxu1 }
 0x126   : > { %v926_v12 = vadd.f32 %v1835_v34, %v1729_v7  ;;  %v1732_v13 = vadd.f32 %v1731_v10, %v1730_v8  ;;  %v1848_v14 = vpop.f32.mrb[22].mxu1  ;;  %v2210_v8 = vld [vmem:[%s2266_s3] ss:$0 sm:$0xff] }
 0x127   : > { %v968_v15 = vpop.f32.mrb[23].mxu1 }
 0x128   : > { %v929_v16 = vadd.f32 %v1836_v39, %v1732_v13 }
 0x12a   : > { %v1733_v17 = vpop.f32.mrb[24].mxu0  ;;  %v1060_v18 = vpack.c.bf16 %v929_v16, %v926_v12 }
 0x12b   : > { %v1734_v19 = vpop.f32.mrb[25].mxu0 }
 0x12c   : > { %v1735_v20 = vadd.f32 %v1734_v19, %v1733_v17  ;;  %v1736_v21 = vpop.f32.mrb[26].mxu0  ;;  %1874 = vmatmul.mubr.bf16.gmra.mrb[32].mxu1 %v1060_v18 }
 0x12d   : > { %v1737_v22 = vpop.f32.mrb[27].mxu0 }
 0x12e   : > { %v1738_v23 = vadd.f32 %v1737_v22, %v1736_v21  ;;  %v934_v24 = vadd.f32 %v1735_v20, %v933_v49 }
 0x130   : > { %v937_v25 = vadd.f32 %v1738_v23, %v936_v53 }
 0x132   : > { %v1061_v26 = vpack.c.bf16 %v937_v25, %v934_v24  ;;  %v1739_v27 = vpop.f32.mrb[28].mxu0 }
 0x133   : > { %v1740_v28 = vpop.f32.mrb[29].mxu0 }
 0x134   : > { %v1741_v29 = vadd.f32 %v1740_v28, %v1739_v27  ;;  %v1742_v30 = vpop.f32.mrb[30].mxu0  ;;  %1877 = vmatprep.mubr.bf16.mxu1 %v1061_v26 }
 0x135   : > { %v1743_v31 = vpop.f32.mrb[31].mxu0 }
 0x136   : > { %v942_v32 = vadd.f32 %v1839_v47, %v1741_v29  ;;  %v1744_v33 = vadd.f32 %v1743_v31, %v1742_v30 }
 0x138   : > { %v945_v34 = vadd.f32 %v1840_v52, %v1744_v33 }
 0x13a   : > { %v1745_v35 = vpop.f32.mrb[32].mxu0  ;;  %v1062_v36 = vpack.c.bf16 %v945_v34, %v942_v32 }
 0x13b   : > { %v1746_v37 = vpop.f32.mrb[33].mxu0 }
 0x13c   : > { %v1747_v38 = vadd.f32 %v1746_v37, %v1745_v35  ;;  %v1748_v39 = vpop.f32.mrb[34].mxu0  ;;  %1878 = vmatmul.mubr.bf16.gmra.mrb[36].mxu1 %v1062_v36 }
 0x13d   : > { %v1749_v40 = vpop.f32.mrb[35].mxu0 }
 0x13e   : > { %v1750_v41 = vadd.f32 %v1749_v40, %v1748_v39  ;;  %v950_v42 = vadd.f32 %v1747_v38, %v949_v62 }
 0x140   : > { %v953_v43 = vadd.f32 %v1750_v41, %v952_v2 }
 0x142   : > { %v1063_v44 = vpack.c.bf16 %v953_v43, %v950_v42  ;;  %v1751_v45 = vpop.f32.mrb[36].mxu0 }
 0x143   : > { %v1752_v46 = vpop.f32.mrb[37].mxu0 }
 0x144   : > { %v1753_v48 = vadd.f32 %v1752_v46, %v1751_v45  ;;  %v1754_v49 = vpop.f32.mrb[38].mxu0  ;;  %1881 = vmatprep.mubr.bf16.mxu1 %v1063_v44 }
 0x145   : > { %v1755_v50 = vpop.f32.mrb[39].mxu0 }
 0x146   : > { %v958_v47 = vadd.f32 %v1843_v60, %v1753_v48  ;;  %v1756_v51 = vadd.f32 %v1755_v50, %v1754_v49 }
 0x148   : > { %v961_v52 = vadd.f32 %v1844_v1, %v1756_v51 }
 0x14a   : > { %v1757_v53 = vpop.f32.mrb[40].mxu0  ;;  %v1064_v54 = vpack.c.bf16 %v961_v52, %v958_v47 }
 0x14b   : > { %v1758_v55 = vpop.f32.mrb[41].mxu0 }
 0x14c   : > { %v1759_v56 = vadd.f32 %v1758_v55, %v1757_v53  ;;  %v1760_v57 = vpop.f32.mrb[42].mxu0  ;;  %1882 = vmatmul.mubr.bf16.gmra.mrb[40].mxu1 %v1064_v54 }
 0x14d   : > { %v1761_v58 = vpop.f32.mrb[43].mxu0 }
 0x14e   : > { %v1762_v59 = vadd.f32 %v1761_v58, %v1760_v57  ;;  %v966_v61 = vadd.f32 %v1759_v56, %v965_v11 }
 0x150   : > { %v969_v62 = vadd.f32 %v1762_v59, %v968_v15 }
 0x152   : > { %v1065_v63 = vpack.c.bf16 %v969_v62, %v966_v61  ;;  %v1763_v0 = vpop.f32.mrb[44].mxu0 }
 0x153   : > { %v1764_v2 = vpop.f32.mrb[45].mxu0 }
 0x154   : > { %v1765_v3 = vadd.f32 %v1764_v2, %v1763_v0  ;;  %v1766_v4 = vpop.f32.mrb[46].mxu0  ;;  %1885 = vmatprep.mubr.bf16.mxu1 %v1065_v63 }
 0x155   : > { %v1767_v60 = vpop.f32.mrb[47].mxu0 }
 0x156   : > { %v974_v1 = vadd.f32 %v2204_v9, %v1765_v3  ;;  %v1768_v5 = vadd.f32 %v1767_v60, %v1766_v4 }
 0x158   : > { %v977_v6 = vadd.f32 %v1848_v14, %v1768_v5 }
 0x15a   : > { %v1066_v7 = vpack.c.bf16 %v977_v6, %v974_v1 }
 0x15c   : > { %1886 = vmatmul.mubr.bf16.gmra.mrb[44].mxu1 %v1066_v7 }
 0x1df   : > { %v1867_v10 = vpop.f32.mrb[24].mxu1 }
 0x1e0   : > { %v1181_v11 = vadd.f32 %v1867_v10, %v2210_v8  ;;  %v1172_v12 = vpop.f32.mrb[25].mxu1 }
 0x1e1   : > { %v1173_v13 = vadd.f32 %v2210_v8, %v1172_v12  ;;  %v1868_v15 = vpop.f32.mrb[26].mxu1 }
 0x1e2   : > { %v1184_v16 = vadd.f32 %v1868_v15, %v2210_v8  ;;  %v1175_v9 = vpop.f32.mrb[27].mxu1  ;;  %v1269_v17 = vmax.f32 %v1181_v11, 0.0 }
 0x1e3   : > { %v1176_v14 = vadd.f32 %v2210_v8, %v1175_v9  ;;  %v1267_v19 = vmax.f32 %v1173_v13, 0.0 }
 0x1e4   : > { %v1270_v18 = vmax.f32 %v1184_v16, 0.0 }
 0x1e5   : > { %v1268_v20 = vmax.f32 %v1176_v14, 0.0 }
 0x1e6   : > { %v1618_v21 = vpack.c.bf16 %v1270_v18, %v1269_v17 }
 0x1e7   : > { %v1613_v22 = vpack.c.bf16 %v1268_v20, %v1267_v19 }
 0x1e8   : > { %1670 = vst [vmem:[%s2220_s26 + $0x8] sm:$0xff] %v1618_v21  }
 0x1e9   : > { %1614 = vst [vmem:[%s2220_s26] sm:$0xff] %v1613_v22  }
 0x1ef   : > { %v1871_v23 = vpop.f32.mrb[28].mxu1 }
 0x1f0   : > { %v1197_v24 = vadd.f32 %v1871_v23, %v2210_v8  ;;  %v1188_v25 = vpop.f32.mrb[29].mxu1 }
 0x1f1   : > { %v1189_v26 = vadd.f32 %v2210_v8, %v1188_v25  ;;  %v1872_v27 = vpop.f32.mrb[30].mxu1 }
 0x1f2   : > { %v1200_v28 = vadd.f32 %v1872_v27, %v2210_v8  ;;  %v1191_v29 = vpop.f32.mrb[31].mxu1  ;;  %v1273_v31 = vmax.f32 %v1197_v24, 0.0 }
 0x1f3   : > { %v1192_v30 = vadd.f32 %v2210_v8, %v1191_v29  ;;  %v1271_v33 = vmax.f32 %v1189_v26, 0.0 }
 0x1f4   : > { %v1274_v32 = vmax.f32 %v1200_v28, 0.0 }
 0x1f5   : > { %v1272_v34 = vmax.f32 %v1192_v30, 0.0 }
 0x1f6   : > { %v1628_v35 = vpack.c.bf16 %v1274_v32, %v1273_v31 }
 0x1f7   : > { %v1623_v36 = vpack.c.bf16 %v1272_v34, %v1271_v33 }
 0x1f8   : > { %1672 = vst [vmem:[%s2220_s26 + $0x18] sm:$0xff] %v1628_v35  }
 0x1f9   : > { %1671 = vst [vmem:[%s2220_s26 + $0x10] sm:$0xff] %v1623_v36  }
 0x1ff   : > { %v1875_v37 = vpop.f32.mrb[32].mxu1 }
 0x200   : > { %v1213_v38 = vadd.f32 %v1875_v37, %v2210_v8  ;;  %v1204_v39 = vpop.f32.mrb[33].mxu1 }
 0x201   : > { %v1205_v40 = vadd.f32 %v2210_v8, %v1204_v39  ;;  %v1876_v41 = vpop.f32.mrb[34].mxu1 }
 0x202   : > { %v1216_v42 = vadd.f32 %v1876_v41, %v2210_v8  ;;  %v1207_v43 = vpop.f32.mrb[35].mxu1  ;;  %v1277_v45 = vmax.f32 %v1213_v38, 0.0 }
 0x203   : > { %v1208_v44 = vadd.f32 %v2210_v8, %v1207_v43  ;;  %v1275_v48 = vmax.f32 %v1205_v40, 0.0 }
 0x204   : > { %v1278_v46 = vmax.f32 %v1216_v42, 0.0 }
 0x205   : > { %v1276_v49 = vmax.f32 %v1208_v44, 0.0 }
 0x206   : > { %v1638_v50 = vpack.c.bf16 %v1278_v46, %v1277_v45 }
 0x207   : > { %v1633_v47 = vpack.c.bf16 %v1276_v49, %v1275_v48 }
 0x208   : > { %1674 = vst [vmem:[%s2220_s26 + $0x28] sm:$0xff] %v1638_v50  }
 0x209   : > { %1673 = vst [vmem:[%s2220_s26 + $0x20] sm:$0xff] %v1633_v47  }
 0x20f   : > { %v1879_v51 = vpop.f32.mrb[36].mxu1 }
 0x210   : > { %v1229_v52 = vadd.f32 %v1879_v51, %v2210_v8  ;;  %v1220_v53 = vpop.f32.mrb[37].mxu1 }
 0x211   : > { %v1221_v54 = vadd.f32 %v2210_v8, %v1220_v53  ;;  %v1880_v55 = vpop.f32.mrb[38].mxu1 }
 0x212   : > { %v1232_v56 = vadd.f32 %v1880_v55, %v2210_v8  ;;  %v1223_v57 = vpop.f32.mrb[39].mxu1  ;;  %v1281_v59 = vmax.f32 %v1229_v52, 0.0 }
 0x213   : > { %v1224_v58 = vadd.f32 %v2210_v8, %v1223_v57  ;;  %v1279_v62 = vmax.f32 %v1221_v54, 0.0 }
 0x214   : > { %v1282_v61 = vmax.f32 %v1232_v56, 0.0 }
 0x215   : > { %v1280_v63 = vmax.f32 %v1224_v58, 0.0 }
 0x216   : > { %v1648_v0 = vpack.c.bf16 %v1282_v61, %v1281_v59 }
 0x217   : > { %v1643_v2 = vpack.c.bf16 %v1280_v63, %v1279_v62 }
 0x218   : > { %1676 = vst [vmem:[%s2220_s26 + $0x38] sm:$0xff] %v1648_v0  }
 0x219   : > { %1675 = vst [vmem:[%s2220_s26 + $0x30] sm:$0xff] %v1643_v2  }
 0x21f   : > { %v1883_v3 = vpop.f32.mrb[40].mxu1 }
 0x220   : > { %v1245_v4 = vadd.f32 %v1883_v3, %v2210_v8  ;;  %v1236_v60 = vpop.f32.mrb[41].mxu1 }
 0x221   : > { %v1237_v1 = vadd.f32 %v2210_v8, %v1236_v60  ;;  %v1884_v5 = vpop.f32.mrb[42].mxu1 }
 0x222   : > { %v1248_v6 = vadd.f32 %v1884_v5, %v2210_v8  ;;  %v1239_v7 = vpop.f32.mrb[43].mxu1  ;;  %v1285_v11 = vmax.f32 %v1245_v4, 0.0 }
 0x223   : > { %v1240_v10 = vadd.f32 %v2210_v8, %v1239_v7  ;;  %v1283_v13 = vmax.f32 %v1237_v1, 0.0 }
 0x224   : > { %v1286_v12 = vmax.f32 %v1248_v6, 0.0 }
 0x225   : > { %v1284_v15 = vmax.f32 %v1240_v10, 0.0 }
 0x226   : > { %v1658_v16 = vpack.c.bf16 %v1286_v12, %v1285_v11 }
 0x227   : > { %v1653_v9 = vpack.c.bf16 %v1284_v15, %v1283_v13 }
 0x228   : > { %1678 = vst [vmem:[%s2220_s26 + $0x48] sm:$0xff] %v1658_v16  }
 0x229   : > { %1677 = vst [vmem:[%s2220_s26 + $0x40] sm:$0xff] %v1653_v9  }
 0x22f   : > { %v1887_v14 = vpop.f32.mrb[44].mxu1 }
 0x230   : > { %v1261_v17 = vadd.f32 %v1887_v14, %v2210_v8  ;;  %v1252_v18 = vpop.f32.mrb[45].mxu1 }
 0x231   : > { %v1253_v19 = vadd.f32 %v2210_v8, %v1252_v18  ;;  %v1888_v20 = vpop.f32.mrb[46].mxu1 }
 0x232   : > { %v1264_v21 = vadd.f32 %v1888_v20, %v2210_v8  ;;  %v1255_v22 = vpop.f32.mrb[47].mxu1  ;;  %v1289_v24 = vmax.f32 %v1261_v17, 0.0 }
 0x233   : > { %v1256_v23 = vadd.f32 %v2210_v8, %v1255_v22  ;;  %v1287_v26 = vmax.f32 %v1253_v19, 0.0 }
 0x234   : > { %v1290_v25 = vmax.f32 %v1264_v21, 0.0 }
 0x235   : > { %v1288_v27 = vmax.f32 %v1256_v23, 0.0 }
 0x236   : > { %v1668_v28 = vpack.c.bf16 %v1290_v25, %v1289_v24 }
 0x237   : > { %v1663_v29 = vpack.c.bf16 %v1288_v27, %v1287_v26 }
 0x238   : > { %1680 = vst [vmem:[%s2220_s26 + $0x58] sm:$0xff] %v1668_v28  }
 0x239   : > { %1679 = vst [vmem:[%s2220_s26 + $0x50] sm:$0xff] %v1663_v29  }
 0x23a PF: > { %s14_s17 = sadd.s32 1, %s2016_s17   ;;  %s2268_s15 = smov %s2012_s16 }
 0x23b   : > { %p11_p5 = scmp.ge.s32.totalorder %s14_s17, 4   ;;  %s2269_s16 = smov %s2271_s18 }
 0x23d   :  { %13 = sbr.rel (!%p11_p5) target bundleno = 2 (0x2), region = 75 }

</bundles_post_ra>
